<compile_context>
chip_gen: v5e
topology: v5e:2x2
jax: 0.10.0
libtpu: 0.0.40
codegen_flags: <defaults>
</compile_context>

<pallas_src>
import jax
import jax.numpy as jnp
from jax.experimental import pallas as pl
from jax.experimental.pallas import tpu as pltpu


# ------------------------------ fused kernel --------------------------------

def make_fused_kernel(num_blocks, feat, cin, nb, H, W, offsets):
    HW = H * W
    M = nb * HW                       # lanes per tile (256 here)
    half = feat // 2
    K9 = 9 * feat
    # static lane shift per 3x3 tap, (dy, dx) row-major -- matches the im2col weight
    shifts = tuple(dy * W + dx for dy in (-1, 0, 1) for dx in (-1, 0, 1))

    def kernel(x_ref, wbuf_ref, o_ref, patch_ref):
        # hoisted once per tile: the 9 precomputed boundary-mask rows
        masks = wbuf_ref[pl.ds(offsets["masks"], 9), :]               # (9, M) f32

        def rows(name, r):            # static, 8-aligned row slice of the packed buffer
            return wbuf_ref[pl.ds(offsets[name], r), :]

        def conv3x3(a, name):
            # im2col patch built straight into a reused bf16 VMEM scratch; each tap is
            # an XLU lane-roll of the activation, masked so out-of-sample (and
            # wrapped) sources are zero -> in-kernel zero padding, one K=9C matmul.
            for t, s in enumerate(shifts):
                rolled = a if s == 0 else pltpu.roll(a, shift=(-s) % M, axis=1)
                patch_ref[pl.ds(t * feat, feat), :] = (
                    rolled * masks[t:t + 1, :]).astype(jnp.bfloat16)
            wrow = rows(name, feat)                                   # [W_folded | shift | 0]
            y = jnp.dot(wrow[:, :K9].astype(jnp.bfloat16), patch_ref[...],
                        preferred_element_type=jnp.float32)           # bf16 MXU, f32 acc
            return y + wrow[:, K9:K9 + 1]                             # folded-BN shift

        # start block: 1x1 conv (BN scale folded into W) + shift + ReLU
        srow = rows("start", feat)
        a = jnp.dot(srow[:, :cin].astype(jnp.bfloat16),
                    x_ref[...].astype(jnp.bfloat16),
                    preferred_element_type=jnp.float32)
        a = jnp.maximum(a + srow[:, cin:cin + 1], 0.0)                # (feat, M)

        # residual tower: conv+BN+ReLU -> conv+BN -> +skip -> ReLU
        for i in range(num_blocks):
            h = jnp.maximum(conv3x3(a, f"b{i}_1"), 0.0)
            a = jnp.maximum(conv3x3(h, f"b{i}_2") + a, 0.0)

        # value head: 1x1 conv (BN folded) + ReLU
        vrow = rows("value", half)
        v = jnp.dot(vrow[:, :feat].astype(jnp.bfloat16),
                    a.astype(jnp.bfloat16),
                    preferred_element_type=jnp.float32)
        v = jnp.maximum(v + vrow[:, feat:feat + 1], 0.0)              # (half, M)

        # Flatten(NCHW) + Linear(v,3) + Linear(3,1) folded offline into one per-pixel
        # weight (wfc) + per-sample reduction (segT rows precomputed, lane-dense).
        wfc = rows("wfc", half)                                       # (half, M)
        colsum = jnp.sum(v * wfc, axis=0, keepdims=True)              # (1, M)
        segT = rows("segT", nb)                                       # (nb, M) 0/1
        bfc = rows("bfc", 1)[:, :1]                                   # (1, 1)
        per = jnp.sum(segT * colsum, axis=1, keepdims=True) + bfc     # (nb, 1)
        o_ref[...] = jnp.tanh(per)

    return kernel


# ---------------------- parameter folding / packing -------------------------

def prepare_params(params, nb, H, W, eps=1e-5):
    """One-time prep outside the jit: fold BN into weights+shift, fold the two
    value-head Linears, precompute tap masks + sample-selection rows, and pack
    everything into ONE (rows, nb*H*W) f32 buffer with static 8-aligned offsets."""
    feat = params["start"]["w"].shape[1]
    cin = params["start"]["w"].shape[0]
    half = params["value_conv"]["w"].shape[1]
    HW = H * W
    M = nb * HW
    K9 = 9 * feat
    LANES = M
    assert LANES % 128 == 0 and LANES >= K9 + 1

    def fold(w_t, conv_bias, bn):
        gamma, beta, mean, var = bn
        scale = gamma / jnp.sqrt(var + eps)
        shift = (conv_bias - mean) * scale + beta
        return jnp.concatenate([w_t * scale[:, None], shift[:, None]], axis=1)

    entries = []
    p = params["start"]
    entries.append(("start", fold(jnp.transpose(p["w"]), p["b"], p["bn"])))
    for i, blk in enumerate(params["blocks"]):
        entries.append((f"b{i}_1", fold(jnp.transpose(blk["w1"].reshape(K9, feat)),
                                        blk["b1"], blk["bn1"])))
        entries.append((f"b{i}_2", fold(jnp.transpose(blk["w2"].reshape(K9, feat)),
                                        blk["b2"], blk["bn2"])))
    p = params["value_conv"]
    entries.append(("value", fold(jnp.transpose(p["w"]), p["b"], p["bn"])))

    # Linear(v,3) -> Linear(3,1), no nonlinearity between them: exact offline fold.
    w_fold = (params["fc1_w"] @ params["fc2_w"]).reshape(-1)          # (v_size,)
    b_fold = (params["fc1_b"] @ params["fc2_w"] + params["fc2_b"]).reshape(1, 1)
    entries.append(("wfc", jnp.tile(w_fold.reshape(half, HW), (1, nb))))   # (half, M)
    entries.append(("bfc", b_fold))

    # 9 per-tap boundary masks + per-tile sample-selection rows (precomputed offline)
    m = jnp.arange(M)
    col = m % W
    row = (m // W) % H
    mrows = []
    for dy in (-1, 0, 1):
        for dx in (-1, 0, 1):
            mrows.append(((col + dx >= 0) & (col + dx < W) &
                          (row + dy >= 0) & (row + dy < H)).astype(jnp.float32))
    entries.append(("masks", jnp.stack(mrows, axis=0)))                # (9, M)
    entries.append(("segT", (m[None, :] // HW ==
                             jnp.arange(nb)[:, None]).astype(jnp.float32)))  # (nb, M)

    offsets, chunks, cur = {}, [], 0
    for name, mat in entries:
        mat = jnp.asarray(mat, jnp.float32)
        r, c = mat.shape
        rp = -(-r // 8) * 8                                            # 8-aligned rows
        chunks.append(jnp.zeros((rp, LANES), jnp.float32).at[:r, :c].set(mat))
        offsets[name] = cur
        cur += rp
    return jnp.concatenate(chunks, axis=0), offsets


def make_forward(num_blocks, feat, cin, N, nb, H, W, offsets, wbuf_shape):
    HW = H * W
    assert N % nb == 0
    M_tile = nb * HW
    T = N // nb
    kernel = make_fused_kernel(num_blocks, feat, cin, nb, H, W, offsets)

    call = pl.pallas_call(
        kernel,
        out_shape=jax.ShapeDtypeStruct((T, nb, 1), jnp.float32),
        grid_spec=pltpu.PrefetchScalarGridSpec(
            num_scalar_prefetch=0,
            grid=(T,),
            in_specs=[
                pl.BlockSpec((cin, M_tile), lambda i: (0, i)),    # activation tile
                pl.BlockSpec(wbuf_shape, lambda i: (0, 0)),       # packed consts, resident
            ],
            out_specs=pl.BlockSpec((None, nb, 1), lambda i: (i, 0, 0)),
            scratch_shapes=[pltpu.VMEM((9 * feat, M_tile), jnp.bfloat16)],  # im2col patch
        ),
        compiler_params=pltpu.CompilerParams(
            dimension_semantics=("parallel",)),                   # both TCs on v7x
    )

    def forward(wbuf, x_nchw):
        # NCHW -> channels-major (Cin, N*H*W): the pixel axis fills all 128 lanes.
        x_t = jnp.transpose(x_nchw, (1, 0, 2, 3)).reshape(cin, N * HW).astype(jnp.float32)
        return call(x_t, wbuf).reshape(N, 1)

    return forward


# --------------------------- pure-JAX reference ------------------------------

def reference_forward(params, x_nchw):
    """Layer-by-layer XLA reference mirroring the PyTorch module (all f32)."""
    hi = jax.lax.Precision.HIGHEST
    x = jnp.transpose(x_nchw, (0, 2, 3, 1)).astype(jnp.float32)       # NHWC

    def bn(y, bias, bnp, eps=1e-5):
        gamma, beta, mean, var = bnp
        return gamma * (y + bias - mean) / jnp.sqrt(var + eps) + beta

    p = params["start"]
    x = jax.nn.relu(bn(jnp.einsum("nhwc,cd->nhwd", x, p["w"], precision=hi),
                       p["b"], p["bn"]))

    def conv3x3(a, w):
        n_, h_, w_sp, _ = a.shape
        ap = jnp.pad(a, ((0, 0), (1, 1), (1, 1), (0, 0)))
        out = jnp.zeros((n_, h_, w_sp, w.shape[-1]), jnp.float32)
        for dy in range(3):
            for dx in range(3):
                out = out + jnp.einsum("nhwc,cd->nhwd",
                                       ap[:, dy:dy + h_, dx:dx + w_sp, :],
                                       w[dy, dx], precision=hi)
        return out

    for blk in params["blocks"]:
        h = jax.nn.relu(bn(conv3x3(x, blk["w1"]), blk["b1"], blk["bn1"]))
        x = jax.nn.relu(bn(conv3x3(h, blk["w2"]), blk["b2"], blk["bn2"]) + x)

    p = params["value_conv"]
    v = jax.nn.relu(bn(jnp.einsum("nhwc,cd->nhwd", x, p["w"], precision=hi),
                       p["b"], p["bn"]))
    v = jnp.transpose(v, (0, 3, 1, 2)).reshape(v.shape[0], -1)        # NCHW flatten
    h = jnp.dot(v, params["fc1_w"], precision=hi) + params["fc1_b"]
    return jnp.tanh(jnp.dot(h, params["fc2_w"], precision=hi) + params["fc2_b"])


# --------------------------- parameter init ----------------------------------

def init_params(key, cin, feat, num_blocks, v_size):
    keys = iter(jax.random.split(key, 64))

    def nrm(shape, s=0.1):
        return jax.random.normal(next(keys), shape, jnp.float32) * s

    def bn(c):
        gamma = 1.0 + 0.1 * jax.random.normal(next(keys), (c,), jnp.float32)
        beta = 0.1 * jax.random.normal(next(keys), (c,), jnp.float32)
        mean = 0.1 * jax.random.normal(next(keys), (c,), jnp.float32)
        var = jnp.abs(jax.random.normal(next(keys), (c,), jnp.float32)) + 0.5
        return (gamma, beta, mean, var)

    params = {}
    params["start"] = dict(w=nrm((cin, feat)), b=nrm((feat,)), bn=bn(feat))
    params["blocks"] = []
    for _ in range(num_blocks):
        params["blocks"].append(dict(
            w1=nrm((3, 3, feat, feat)), b1=nrm((feat,)), bn1=bn(feat),
            w2=nrm((3, 3, feat, feat)), b2=nrm((feat,)), bn2=bn(feat)))
    half = feat // 2
    params["value_conv"] = dict(w=nrm((feat, half)), b=nrm((half,)), bn=bn(half))
    params["fc1_w"] = nrm((v_size, 3))
    params["fc1_b"] = nrm((3,))
    params["fc2_w"] = nrm((3, 1))
    params["fc2_b"] = nrm((1,))
    return params


# --------------------------------- main --------------------------------------

if __name__ == "__main__":
    num_blocks = 2
    num_features = 16
    num_input_features = 4
    H = W = 8                      # value head is sized for 8x8 boards (see spec)
    N = 8                          # batch
    nb = 4                         # samples per grid tile -> 256 lanes per matmul
    v_size = (num_features // 2) * H * W   # = 512, matches calculate_value_input_size

    key = jax.random.PRNGKey(0)
    pkey, xkey = jax.random.split(key)
    params = init_params(pkey, num_input_features, num_features, num_blocks, v_size)
    x = jax.random.normal(xkey, (N, num_input_features, H, W), jnp.float32)  # NCHW

    wbuf, offsets = prepare_params(params, nb, H, W)
    fwd = jax.jit(make_forward(num_blocks, num_features, num_input_features,
                               N, nb, H, W, offsets, tuple(wbuf.shape)))
    out = jax.block_until_ready(fwd(wbuf, x))

    assert out.shape == (N, 1), out.shape
    assert bool(jnp.all(jnp.isfinite(out))), "non-finite output"

    ref = reference_forward(params, x)
    # Tolerance accounts for bf16 MXU operands (f32 accumulation) per the perf review.
    err = float(jnp.max(jnp.abs(out - ref)))
    assert bool(jnp.allclose(out, ref, atol=2e-2, rtol=2e-2)), (err, out, ref)

    print("KERNEL_OK")
</pallas_src>

<mosaic_0001>
module attributes {stable_mosaic.version = 11 : i64} {
  func.func @kernel(%arg0: i32, %arg1: memref<4x256xf32, #tpu.memory_space<vmem>>, %arg2: memref<128x256xf32, #tpu.memory_space<vmem>>, %arg3: memref<1x4x1xf32, #tpu.memory_space<vmem>>, %arg4: memref<144x256xbf16, #tpu.memory_space<vmem>>) attributes {dimension_semantics = [#tpu.dimension_semantics<parallel>], iteration_bounds = array<i64: 2>, scalar_prefetch = 0 : i64, scratch_operands = 1 : i64, tpu.core_type = #tpu.core_type<tc>, window_params = [{transform_indices = @transform_0, window_bounds = array<i64: 4, 256>}, {pipeline_mode = #tpu.pipeline_mode<synchronous>, transform_indices = @transform_1, window_bounds = array<i64: 128, 256>}, {transform_indices = @transform_2, window_bounds = array<i64: 1, 4, 1>}]} {
    %c104 = arith.constant 104 : index
    %c0 = arith.constant 0 : index
    %0 = vector.load %arg2[%c104, %c0] : memref<128x256xf32, #tpu.memory_space<vmem>>, vector<9x256xf32>
    %c0_0 = arith.constant 0 : index
    %c0_1 = arith.constant 0 : index
    %1 = vector.load %arg2[%c0_0, %c0_1] : memref<128x256xf32, #tpu.memory_space<vmem>>, vector<16x256xf32>
    %2 = vector.extract_strided_slice %1 {offsets = [0, 0], sizes = [16, 4], strides = [1, 1]} : vector<16x256xf32> to vector<16x4xf32>
    %3 = arith.truncf %2 : vector<16x4xf32> to vector<16x4xbf16>
    %c0_2 = arith.constant 0 : index
    %c0_3 = arith.constant 0 : index
    %4 = vector.load %arg1[%c0_2, %c0_3] : memref<4x256xf32, #tpu.memory_space<vmem>>, vector<4x256xf32>
    %5 = arith.truncf %4 : vector<4x256xf32> to vector<4x256xbf16>
    %cst = arith.constant dense<0.000000e+00> : vector<16x256xf32>
    %6 = tpu.matmul %3, %5, %cst {dimension_numbers = #tpu.dot_dimension_numbers<[1], [0], [0], [1], [0, 0, 1, 1], [], []>} : vector<16x4xbf16>, vector<4x256xbf16>, vector<16x256xf32> -> vector<16x256xf32>
    %7 = vector.extract_strided_slice %1 {offsets = [0, 4], sizes = [16, 1], strides = [1, 1]} : vector<16x256xf32> to vector<16x1xf32>
    %8 = vector.broadcast %7 : vector<16x1xf32> to vector<16x256xf32>
    %9 = arith.addf %6, %8 : vector<16x256xf32>
    %cst_4 = arith.constant 0.000000e+00 : f32
    %10 = vector.broadcast %cst_4 : f32 to vector<16x256xf32>
    %11 = arith.maximumf %9, %10 : vector<16x256xf32>
    %c9_i32 = arith.constant 9 : i32
    %12 = tpu.dynamic_rotate %11 by %c9_i32 dim 1 : vector<16x256xf32>, i32 -> vector<16x256xf32>
    %13 = vector.extract_strided_slice %0 {offsets = [0, 0], sizes = [1, 256], strides = [1, 1]} : vector<9x256xf32> to vector<1x256xf32>
    %14 = vector.broadcast %13 : vector<1x256xf32> to vector<16x256xf32>
    %15 = arith.mulf %12, %14 : vector<16x256xf32>
    %16 = arith.truncf %15 : vector<16x256xf32> to vector<16x256xbf16>
    %c0_5 = arith.constant 0 : index
    %c0_6 = arith.constant 0 : index
    %17 = vector.load %arg4[%c0_5, %c0_6] : memref<144x256xbf16, #tpu.memory_space<vmem>>, vector<16x256xbf16>
    tpu.vector_store %arg4[%c0_5, %c0_6], %16 {strides = array<i32>} : memref<144x256xbf16, #tpu.memory_space<vmem>>, vector<16x256xbf16>,
    %c8_i32 = arith.constant 8 : i32
    %18 = tpu.dynamic_rotate %11 by %c8_i32 dim 1 : vector<16x256xf32>, i32 -> vector<16x256xf32>
    %19 = vector.extract_strided_slice %0 {offsets = [1, 0], sizes = [1, 256], strides = [1, 1]} : vector<9x256xf32> to vector<1x256xf32>
    %20 = vector.broadcast %19 : vector<1x256xf32> to vector<16x256xf32>
    %21 = arith.mulf %18, %20 : vector<16x256xf32>
    %22 = arith.truncf %21 : vector<16x256xf32> to vector<16x256xbf16>
    %c16 = arith.constant 16 : index
    %c0_7 = arith.constant 0 : index
    %23 = vector.load %arg4[%c16, %c0_7] : memref<144x256xbf16, #tpu.memory_space<vmem>>, vector<16x256xbf16>
    tpu.vector_store %arg4[%c16, %c0_7], %22 {strides = array<i32>} : memref<144x256xbf16, #tpu.memory_space<vmem>>, vector<16x256xbf16>,
    %c7_i32 = arith.constant 7 : i32
    %24 = tpu.dynamic_rotate %11 by %c7_i32 dim 1 : vector<16x256xf32>, i32 -> vector<16x256xf32>
    %25 = vector.extract_strided_slice %0 {offsets = [2, 0], sizes = [1, 256], strides = [1, 1]} : vector<9x256xf32> to vector<1x256xf32>
    %26 = vector.broadcast %25 : vector<1x256xf32> to vector<16x256xf32>
    %27 = arith.mulf %24, %26 : vector<16x256xf32>
    %28 = arith.truncf %27 : vector<16x256xf32> to vector<16x256xbf16>
    %c32 = arith.constant 32 : index
    %c0_8 = arith.constant 0 : index
    %29 = vector.load %arg4[%c32, %c0_8] : memref<144x256xbf16, #tpu.memory_space<vmem>>, vector<16x256xbf16>
    tpu.vector_store %arg4[%c32, %c0_8], %28 {strides = array<i32>} : memref<144x256xbf16, #tpu.memory_space<vmem>>, vector<16x256xbf16>,
    %c1_i32 = arith.constant 1 : i32
    %30 = tpu.dynamic_rotate %11 by %c1_i32 dim 1 : vector<16x256xf32>, i32 -> vector<16x256xf32>
    %31 = vector.extract_strided_slice %0 {offsets = [3, 0], sizes = [1, 256], strides = [1, 1]} : vector<9x256xf32> to vector<1x256xf32>
    %32 = vector.broadcast %31 : vector<1x256xf32> to vector<16x256xf32>
    %33 = arith.mulf %30, %32 : vector<16x256xf32>
    %34 = arith.truncf %33 : vector<16x256xf32> to vector<16x256xbf16>
    %c48 = arith.constant 48 : index
    %c0_9 = arith.constant 0 : index
    %35 = vector.load %arg4[%c48, %c0_9] : memref<144x256xbf16, #tpu.memory_space<vmem>>, vector<16x256xbf16>
    tpu.vector_store %arg4[%c48, %c0_9], %34 {strides = array<i32>} : memref<144x256xbf16, #tpu.memory_space<vmem>>, vector<16x256xbf16>,
    %36 = vector.extract_strided_slice %0 {offsets = [4, 0], sizes = [1, 256], strides = [1, 1]} : vector<9x256xf32> to vector<1x256xf32>
    %37 = vector.broadcast %36 : vector<1x256xf32> to vector<16x256xf32>
    %38 = arith.mulf %11, %37 : vector<16x256xf32>
    %39 = arith.truncf %38 : vector<16x256xf32> to vector<16x256xbf16>
    %c64 = arith.constant 64 : index
    %c0_10 = arith.constant 0 : index
    %40 = vector.load %arg4[%c64, %c0_10] : memref<144x256xbf16, #tpu.memory_space<vmem>>, vector<16x256xbf16>
    tpu.vector_store %arg4[%c64, %c0_10], %39 {strides = array<i32>} : memref<144x256xbf16, #tpu.memory_space<vmem>>, vector<16x256xbf16>,
    %c255_i32 = arith.constant 255 : i32
    %41 = tpu.dynamic_rotate %11 by %c255_i32 dim 1 : vector<16x256xf32>, i32 -> vector<16x256xf32>
    %42 = vector.extract_strided_slice %0 {offsets = [5, 0], sizes = [1, 256], strides = [1, 1]} : vector<9x256xf32> to vector<1x256xf32>
    %43 = vector.broadcast %42 : vector<1x256xf32> to vector<16x256xf32>
    %44 = arith.mulf %41, %43 : vector<16x256xf32>
    %45 = arith.truncf %44 : vector<16x256xf32> to vector<16x256xbf16>
    %c80 = arith.constant 80 : index
    %c0_11 = arith.constant 0 : index
    %46 = vector.load %arg4[%c80, %c0_11] : memref<144x256xbf16, #tpu.memory_space<vmem>>, vector<16x256xbf16>
    tpu.vector_store %arg4[%c80, %c0_11], %45 {strides = array<i32>} : memref<144x256xbf16, #tpu.memory_space<vmem>>, vector<16x256xbf16>,
    %c249_i32 = arith.constant 249 : i32
    %47 = tpu.dynamic_rotate %11 by %c249_i32 dim 1 : vector<16x256xf32>, i32 -> vector<16x256xf32>
    %48 = vector.extract_strided_slice %0 {offsets = [6, 0], sizes = [1, 256], strides = [1, 1]} : vector<9x256xf32> to vector<1x256xf32>
    %49 = vector.broadcast %48 : vector<1x256xf32> to vector<16x256xf32>
    %50 = arith.mulf %47, %49 : vector<16x256xf32>
    %51 = arith.truncf %50 : vector<16x256xf32> to vector<16x256xbf16>
    %c96 = arith.constant 96 : index
    %c0_12 = arith.constant 0 : index
    %52 = vector.load %arg4[%c96, %c0_12] : memref<144x256xbf16, #tpu.memory_space<vmem>>, vector<16x256xbf16>
    tpu.vector_store %arg4[%c96, %c0_12], %51 {strides = array<i32>} : memref<144x256xbf16, #tpu.memory_space<vmem>>, vector<16x256xbf16>,
    %c248_i32 = arith.constant 248 : i32
    %53 = tpu.dynamic_rotate %11 by %c248_i32 dim 1 : vector<16x256xf32>, i32 -> vector<16x256xf32>
    %54 = vector.extract_strided_slice %0 {offsets = [7, 0], sizes = [1, 256], strides = [1, 1]} : vector<9x256xf32> to vector<1x256xf32>
    %55 = vector.broadcast %54 : vector<1x256xf32> to vector<16x256xf32>
    %56 = arith.mulf %53, %55 : vector<16x256xf32>
    %57 = arith.truncf %56 : vector<16x256xf32> to vector<16x256xbf16>
    %c112 = arith.constant 112 : index
    %c0_13 = arith.constant 0 : index
    %58 = vector.load %arg4[%c112, %c0_13] : memref<144x256xbf16, #tpu.memory_space<vmem>>, vector<16x256xbf16>
    tpu.vector_store %arg4[%c112, %c0_13], %57 {strides = array<i32>} : memref<144x256xbf16, #tpu.memory_space<vmem>>, vector<16x256xbf16>,
    %c247_i32 = arith.constant 247 : i32
    %59 = tpu.dynamic_rotate %11 by %c247_i32 dim 1 : vector<16x256xf32>, i32 -> vector<16x256xf32>
    %60 = vector.extract_strided_slice %0 {offsets = [8, 0], sizes = [1, 256], strides = [1, 1]} : vector<9x256xf32> to vector<1x256xf32>
    %61 = vector.broadcast %60 : vector<1x256xf32> to vector<16x256xf32>
    %62 = arith.mulf %59, %61 : vector<16x256xf32>
    %63 = arith.truncf %62 : vector<16x256xf32> to vector<16x256xbf16>
    %c128 = arith.constant 128 : index
    %c0_14 = arith.constant 0 : index
    %64 = vector.load %arg4[%c128, %c0_14] : memref<144x256xbf16, #tpu.memory_space<vmem>>, vector<16x256xbf16>
    tpu.vector_store %arg4[%c128, %c0_14], %63 {strides = array<i32>} : memref<144x256xbf16, #tpu.memory_space<vmem>>, vector<16x256xbf16>,
    %c16_15 = arith.constant 16 : index
    %c0_16 = arith.constant 0 : index
    %65 = vector.load %arg2[%c16_15, %c0_16] : memref<128x256xf32, #tpu.memory_space<vmem>>, vector<16x256xf32>
    %66 = vector.extract_strided_slice %65 {offsets = [0, 0], sizes = [16, 144], strides = [1, 1]} : vector<16x256xf32> to vector<16x144xf32>
    %67 = arith.truncf %66 : vector<16x144xf32> to vector<16x144xbf16>
    %c0_17 = arith.constant 0 : index
    %c0_18 = arith.constant 0 : index
    %68 = vector.load %arg4[%c0_17, %c0_18] : memref<144x256xbf16, #tpu.memory_space<vmem>>, vector<144x256xbf16>
    %cst_19 = arith.constant dense<0.000000e+00> : vector<16x256xf32>
    %69 = tpu.matmul %67, %68, %cst_19 {dimension_numbers = #tpu.dot_dimension_numbers<[1], [0], [0], [1], [0, 0, 1, 1], [], []>} : vector<16x144xbf16>, vector<144x256xbf16>, vector<16x256xf32> -> vector<16x256xf32>
    %70 = vector.extract_strided_slice %65 {offsets = [0, 144], sizes = [16, 1], strides = [1, 1]} : vector<16x256xf32> to vector<16x1xf32>
    %71 = vector.broadcast %70 : vector<16x1xf32> to vector<16x256xf32>
    %72 = arith.addf %69, %71 : vector<16x256xf32>
    %cst_20 = arith.constant 0.000000e+00 : f32
    %73 = vector.broadcast %cst_20 : f32 to vector<16x256xf32>
    %74 = arith.maximumf %72, %73 : vector<16x256xf32>
    %c9_i32_21 = arith.constant 9 : i32
    %75 = tpu.dynamic_rotate %74 by %c9_i32_21 dim 1 : vector<16x256xf32>, i32 -> vector<16x256xf32>
    %76 = vector.extract_strided_slice %0 {offsets = [0, 0], sizes = [1, 256], strides = [1, 1]} : vector<9x256xf32> to vector<1x256xf32>
    %77 = vector.broadcast %76 : vector<1x256xf32> to vector<16x256xf32>
    %78 = arith.mulf %75, %77 : vector<16x256xf32>
    %79 = arith.truncf %78 : vector<16x256xf32> to vector<16x256xbf16>
    %c0_22 = arith.constant 0 : index
    %c0_23 = arith.constant 0 : index
    %80 = vector.load %arg4[%c0_22, %c0_23] : memref<144x256xbf16, #tpu.memory_space<vmem>>, vector<16x256xbf16>
    tpu.vector_store %arg4[%c0_22, %c0_23], %79 {strides = array<i32>} : memref<144x256xbf16, #tpu.memory_space<vmem>>, vector<16x256xbf16>,
    %c8_i32_24 = arith.constant 8 : i32
    %81 = tpu.dynamic_rotate %74 by %c8_i32_24 dim 1 : vector<16x256xf32>, i32 -> vector<16x256xf32>
    %82 = vector.extract_strided_slice %0 {offsets = [1, 0], sizes = [1, 256], strides = [1, 1]} : vector<9x256xf32> to vector<1x256xf32>
    %83 = vector.broadcast %82 : vector<1x256xf32> to vector<16x256xf32>
    %84 = arith.mulf %81, %83 : vector<16x256xf32>
    %85 = arith.truncf %84 : vector<16x256xf32> to vector<16x256xbf16>
    %c16_25 = arith.constant 16 : index
    %c0_26 = arith.constant 0 : index
    %86 = vector.load %arg4[%c16_25, %c0_26] : memref<144x256xbf16, #tpu.memory_space<vmem>>, vector<16x256xbf16>
    tpu.vector_store %arg4[%c16_25, %c0_26], %85 {strides = array<i32>} : memref<144x256xbf16, #tpu.memory_space<vmem>>, vector<16x256xbf16>,
    %c7_i32_27 = arith.constant 7 : i32
    %87 = tpu.dynamic_rotate %74 by %c7_i32_27 dim 1 : vector<16x256xf32>, i32 -> vector<16x256xf32>
    %88 = vector.extract_strided_slice %0 {offsets = [2, 0], sizes = [1, 256], strides = [1, 1]} : vector<9x256xf32> to vector<1x256xf32>
    %89 = vector.broadcast %88 : vector<1x256xf32> to vector<16x256xf32>
    %90 = arith.mulf %87, %89 : vector<16x256xf32>
    %91 = arith.truncf %90 : vector<16x256xf32> to vector<16x256xbf16>
    %c32_28 = arith.constant 32 : index
    %c0_29 = arith.constant 0 : index
    %92 = vector.load %arg4[%c32_28, %c0_29] : memref<144x256xbf16, #tpu.memory_space<vmem>>, vector<16x256xbf16>
    tpu.vector_store %arg4[%c32_28, %c0_29], %91 {strides = array<i32>} : memref<144x256xbf16, #tpu.memory_space<vmem>>, vector<16x256xbf16>,
    %c1_i32_30 = arith.constant 1 : i32
    %93 = tpu.dynamic_rotate %74 by %c1_i32_30 dim 1 : vector<16x256xf32>, i32 -> vector<16x256xf32>
    %94 = vector.extract_strided_slice %0 {offsets = [3, 0], sizes = [1, 256], strides = [1, 1]} : vector<9x256xf32> to vector<1x256xf32>
    %95 = vector.broadcast %94 : vector<1x256xf32> to vector<16x256xf32>
    %96 = arith.mulf %93, %95 : vector<16x256xf32>
    %97 = arith.truncf %96 : vector<16x256xf32> to vector<16x256xbf16>
    %c48_31 = arith.constant 48 : index
    %c0_32 = arith.constant 0 : index
    %98 = vector.load %arg4[%c48_31, %c0_32] : memref<144x256xbf16, #tpu.memory_space<vmem>>, vector<16x256xbf16>
    tpu.vector_store %arg4[%c48_31, %c0_32], %97 {strides = array<i32>} : memref<144x256xbf16, #tpu.memory_space<vmem>>, vector<16x256xbf16>,
    %99 = vector.extract_strided_slice %0 {offsets = [4, 0], sizes = [1, 256], strides = [1, 1]} : vector<9x256xf32> to vector<1x256xf32>
    %100 = vector.broadcast %99 : vector<1x256xf32> to vector<16x256xf32>
    %101 = arith.mulf %74, %100 : vector<16x256xf32>
    %102 = arith.truncf %101 : vector<16x256xf32> to vector<16x256xbf16>
    %c64_33 = arith.constant 64 : index
    %c0_34 = arith.constant 0 : index
    %103 = vector.load %arg4[%c64_33, %c0_34] : memref<144x256xbf16, #tpu.memory_space<vmem>>, vector<16x256xbf16>
    tpu.vector_store %arg4[%c64_33, %c0_34], %102 {strides = array<i32>} : memref<144x256xbf16, #tpu.memory_space<vmem>>, vector<16x256xbf16>,
    %c255_i32_35 = arith.constant 255 : i32
    %104 = tpu.dynamic_rotate %74 by %c255_i32_35 dim 1 : vector<16x256xf32>, i32 -> vector<16x256xf32>
    %105 = vector.extract_strided_slice %0 {offsets = [5, 0], sizes = [1, 256], strides = [1, 1]} : vector<9x256xf32> to vector<1x256xf32>
    %106 = vector.broadcast %105 : vector<1x256xf32> to vector<16x256xf32>
    %107 = arith.mulf %104, %106 : vector<16x256xf32>
    %108 = arith.truncf %107 : vector<16x256xf32> to vector<16x256xbf16>
    %c80_36 = arith.constant 80 : index
    %c0_37 = arith.constant 0 : index
    %109 = vector.load %arg4[%c80_36, %c0_37] : memref<144x256xbf16, #tpu.memory_space<vmem>>, vector<16x256xbf16>
    tpu.vector_store %arg4[%c80_36, %c0_37], %108 {strides = array<i32>} : memref<144x256xbf16, #tpu.memory_space<vmem>>, vector<16x256xbf16>,
    %c249_i32_38 = arith.constant 249 : i32
    %110 = tpu.dynamic_rotate %74 by %c249_i32_38 dim 1 : vector<16x256xf32>, i32 -> vector<16x256xf32>
    %111 = vector.extract_strided_slice %0 {offsets = [6, 0], sizes = [1, 256], strides = [1, 1]} : vector<9x256xf32> to vector<1x256xf32>
    %112 = vector.broadcast %111 : vector<1x256xf32> to vector<16x256xf32>
    %113 = arith.mulf %110, %112 : vector<16x256xf32>
    %114 = arith.truncf %113 : vector<16x256xf32> to vector<16x256xbf16>
    %c96_39 = arith.constant 96 : index
    %c0_40 = arith.constant 0 : index
    %115 = vector.load %arg4[%c96_39, %c0_40] : memref<144x256xbf16, #tpu.memory_space<vmem>>, vector<16x256xbf16>
    tpu.vector_store %arg4[%c96_39, %c0_40], %114 {strides = array<i32>} : memref<144x256xbf16, #tpu.memory_space<vmem>>, vector<16x256xbf16>,
    %c248_i32_41 = arith.constant 248 : i32
    %116 = tpu.dynamic_rotate %74 by %c248_i32_41 dim 1 : vector<16x256xf32>, i32 -> vector<16x256xf32>
    %117 = vector.extract_strided_slice %0 {offsets = [7, 0], sizes = [1, 256], strides = [1, 1]} : vector<9x256xf32> to vector<1x256xf32>
    %118 = vector.broadcast %117 : vector<1x256xf32> to vector<16x256xf32>
    %119 = arith.mulf %116, %118 : vector<16x256xf32>
    %120 = arith.truncf %119 : vector<16x256xf32> to vector<16x256xbf16>
    %c112_42 = arith.constant 112 : index
    %c0_43 = arith.constant 0 : index
    %121 = vector.load %arg4[%c112_42, %c0_43] : memref<144x256xbf16, #tpu.memory_space<vmem>>, vector<16x256xbf16>
    tpu.vector_store %arg4[%c112_42, %c0_43], %120 {strides = array<i32>} : memref<144x256xbf16, #tpu.memory_space<vmem>>, vector<16x256xbf16>,
    %c247_i32_44 = arith.constant 247 : i32
    %122 = tpu.dynamic_rotate %74 by %c247_i32_44 dim 1 : vector<16x256xf32>, i32 -> vector<16x256xf32>
    %123 = vector.extract_strided_slice %0 {offsets = [8, 0], sizes = [1, 256], strides = [1, 1]} : vector<9x256xf32> to vector<1x256xf32>
    %124 = vector.broadcast %123 : vector<1x256xf32> to vector<16x256xf32>
    %125 = arith.mulf %122, %124 : vector<16x256xf32>
    %126 = arith.truncf %125 : vector<16x256xf32> to vector<16x256xbf16>
    %c128_45 = arith.constant 128 : index
    %c0_46 = arith.constant 0 : index
    %127 = vector.load %arg4[%c128_45, %c0_46] : memref<144x256xbf16, #tpu.memory_space<vmem>>, vector<16x256xbf16>
    tpu.vector_store %arg4[%c128_45, %c0_46], %126 {strides = array<i32>} : memref<144x256xbf16, #tpu.memory_space<vmem>>, vector<16x256xbf16>,
    %c32_47 = arith.constant 32 : index
    %c0_48 = arith.constant 0 : index
    %128 = vector.load %arg2[%c32_47, %c0_48] : memref<128x256xf32, #tpu.memory_space<vmem>>, vector<16x256xf32>
    %129 = vector.extract_strided_slice %128 {offsets = [0, 0], sizes = [16, 144], strides = [1, 1]} : vector<16x256xf32> to vector<16x144xf32>
    %130 = arith.truncf %129 : vector<16x144xf32> to vector<16x144xbf16>
    %c0_49 = arith.constant 0 : index
    %c0_50 = arith.constant 0 : index
    %131 = vector.load %arg4[%c0_49, %c0_50] : memref<144x256xbf16, #tpu.memory_space<vmem>>, vector<144x256xbf16>
    %cst_51 = arith.constant dense<0.000000e+00> : vector<16x256xf32>
    %132 = tpu.matmul %130, %131, %cst_51 {dimension_numbers = #tpu.dot_dimension_numbers<[1], [0], [0], [1], [0, 0, 1, 1], [], []>} : vector<16x144xbf16>, vector<144x256xbf16>, vector<16x256xf32> -> vector<16x256xf32>
    %133 = vector.extract_strided_slice %128 {offsets = [0, 144], sizes = [16, 1], strides = [1, 1]} : vector<16x256xf32> to vector<16x1xf32>
    %134 = vector.broadcast %133 : vector<16x1xf32> to vector<16x256xf32>
    %135 = arith.addf %132, %134 : vector<16x256xf32>
    %136 = arith.addf %135, %11 : vector<16x256xf32>
    %cst_52 = arith.constant 0.000000e+00 : f32
    %137 = vector.broadcast %cst_52 : f32 to vector<16x256xf32>
    %138 = arith.maximumf %136, %137 : vector<16x256xf32>
    %c9_i32_53 = arith.constant 9 : i32
    %139 = tpu.dynamic_rotate %138 by %c9_i32_53 dim 1 : vector<16x256xf32>, i32 -> vector<16x256xf32>
    %140 = vector.extract_strided_slice %0 {offsets = [0, 0], sizes = [1, 256], strides = [1, 1]} : vector<9x256xf32> to vector<1x256xf32>
    %141 = vector.broadcast %140 : vector<1x256xf32> to vector<16x256xf32>
    %142 = arith.mulf %139, %141 : vector<16x256xf32>
    %143 = arith.truncf %142 : vector<16x256xf32> to vector<16x256xbf16>
    %c0_54 = arith.constant 0 : index
    %c0_55 = arith.constant 0 : index
    %144 = vector.load %arg4[%c0_54, %c0_55] : memref<144x256xbf16, #tpu.memory_space<vmem>>, vector<16x256xbf16>
    tpu.vector_store %arg4[%c0_54, %c0_55], %143 {strides = array<i32>} : memref<144x256xbf16, #tpu.memory_space<vmem>>, vector<16x256xbf16>,
    %c8_i32_56 = arith.constant 8 : i32
    %145 = tpu.dynamic_rotate %138 by %c8_i32_56 dim 1 : vector<16x256xf32>, i32 -> vector<16x256xf32>
    %146 = vector.extract_strided_slice %0 {offsets = [1, 0], sizes = [1, 256], strides = [1, 1]} : vector<9x256xf32> to vector<1x256xf32>
    %147 = vector.broadcast %146 : vector<1x256xf32> to vector<16x256xf32>
    %148 = arith.mulf %145, %147 : vector<16x256xf32>
    %149 = arith.truncf %148 : vector<16x256xf32> to vector<16x256xbf16>
    %c16_57 = arith.constant 16 : index
    %c0_58 = arith.constant 0 : index
    %150 = vector.load %arg4[%c16_57, %c0_58] : memref<144x256xbf16, #tpu.memory_space<vmem>>, vector<16x256xbf16>
    tpu.vector_store %arg4[%c16_57, %c0_58], %149 {strides = array<i32>} : memref<144x256xbf16, #tpu.memory_space<vmem>>, vector<16x256xbf16>,
    %c7_i32_59 = arith.constant 7 : i32
    %151 = tpu.dynamic_rotate %138 by %c7_i32_59 dim 1 : vector<16x256xf32>, i32 -> vector<16x256xf32>
    %152 = vector.extract_strided_slice %0 {offsets = [2, 0], sizes = [1, 256], strides = [1, 1]} : vector<9x256xf32> to vector<1x256xf32>
    %153 = vector.broadcast %152 : vector<1x256xf32> to vector<16x256xf32>
    %154 = arith.mulf %151, %153 : vector<16x256xf32>
    %155 = arith.truncf %154 : vector<16x256xf32> to vector<16x256xbf16>
    %c32_60 = arith.constant 32 : index
    %c0_61 = arith.constant 0 : index
    %156 = vector.load %arg4[%c32_60, %c0_61] : memref<144x256xbf16, #tpu.memory_space<vmem>>, vector<16x256xbf16>
    tpu.vector_store %arg4[%c32_60, %c0_61], %155 {strides = array<i32>} : memref<144x256xbf16, #tpu.memory_space<vmem>>, vector<16x256xbf16>,
    %c1_i32_62 = arith.constant 1 : i32
    %157 = tpu.dynamic_rotate %138 by %c1_i32_62 dim 1 : vector<16x256xf32>, i32 -> vector<16x256xf32>
    %158 = vector.extract_strided_slice %0 {offsets = [3, 0], sizes = [1, 256], strides = [1, 1]} : vector<9x256xf32> to vector<1x256xf32>
    %159 = vector.broadcast %158 : vector<1x256xf32> to vector<16x256xf32>
    %160 = arith.mulf %157, %159 : vector<16x256xf32>
    %161 = arith.truncf %160 : vector<16x256xf32> to vector<16x256xbf16>
    %c48_63 = arith.constant 48 : index
    %c0_64 = arith.constant 0 : index
    %162 = vector.load %arg4[%c48_63, %c0_64] : memref<144x256xbf16, #tpu.memory_space<vmem>>, vector<16x256xbf16>
    tpu.vector_store %arg4[%c48_63, %c0_64], %161 {strides = array<i32>} : memref<144x256xbf16, #tpu.memory_space<vmem>>, vector<16x256xbf16>,
    %163 = vector.extract_strided_slice %0 {offsets = [4, 0], sizes = [1, 256], strides = [1, 1]} : vector<9x256xf32> to vector<1x256xf32>
    %164 = vector.broadcast %163 : vector<1x256xf32> to vector<16x256xf32>
    %165 = arith.mulf %138, %164 : vector<16x256xf32>
    %166 = arith.truncf %165 : vector<16x256xf32> to vector<16x256xbf16>
    %c64_65 = arith.constant 64 : index
    %c0_66 = arith.constant 0 : index
    %167 = vector.load %arg4[%c64_65, %c0_66] : memref<144x256xbf16, #tpu.memory_space<vmem>>, vector<16x256xbf16>
    tpu.vector_store %arg4[%c64_65, %c0_66], %166 {strides = array<i32>} : memref<144x256xbf16, #tpu.memory_space<vmem>>, vector<16x256xbf16>,
    %c255_i32_67 = arith.constant 255 : i32
    %168 = tpu.dynamic_rotate %138 by %c255_i32_67 dim 1 : vector<16x256xf32>, i32 -> vector<16x256xf32>
    %169 = vector.extract_strided_slice %0 {offsets = [5, 0], sizes = [1, 256], strides = [1, 1]} : vector<9x256xf32> to vector<1x256xf32>
    %170 = vector.broadcast %169 : vector<1x256xf32> to vector<16x256xf32>
    %171 = arith.mulf %168, %170 : vector<16x256xf32>
    %172 = arith.truncf %171 : vector<16x256xf32> to vector<16x256xbf16>
    %c80_68 = arith.constant 80 : index
    %c0_69 = arith.constant 0 : index
    %173 = vector.load %arg4[%c80_68, %c0_69] : memref<144x256xbf16, #tpu.memory_space<vmem>>, vector<16x256xbf16>
    tpu.vector_store %arg4[%c80_68, %c0_69], %172 {strides = array<i32>} : memref<144x256xbf16, #tpu.memory_space<vmem>>, vector<16x256xbf16>,
    %c249_i32_70 = arith.constant 249 : i32
    %174 = tpu.dynamic_rotate %138 by %c249_i32_70 dim 1 : vector<16x256xf32>, i32 -> vector<16x256xf32>
    %175 = vector.extract_strided_slice %0 {offsets = [6, 0], sizes = [1, 256], strides = [1, 1]} : vector<9x256xf32> to vector<1x256xf32>
    %176 = vector.broadcast %175 : vector<1x256xf32> to vector<16x256xf32>
    %177 = arith.mulf %174, %176 : vector<16x256xf32>
    %178 = arith.truncf %177 : vector<16x256xf32> to vector<16x256xbf16>
    %c96_71 = arith.constant 96 : index
    %c0_72 = arith.constant 0 : index
    %179 = vector.load %arg4[%c96_71, %c0_72] : memref<144x256xbf16, #tpu.memory_space<vmem>>, vector<16x256xbf16>
    tpu.vector_store %arg4[%c96_71, %c0_72], %178 {strides = array<i32>} : memref<144x256xbf16, #tpu.memory_space<vmem>>, vector<16x256xbf16>,
    %c248_i32_73 = arith.constant 248 : i32
    %180 = tpu.dynamic_rotate %138 by %c248_i32_73 dim 1 : vector<16x256xf32>, i32 -> vector<16x256xf32>
    %181 = vector.extract_strided_slice %0 {offsets = [7, 0], sizes = [1, 256], strides = [1, 1]} : vector<9x256xf32> to vector<1x256xf32>
    %182 = vector.broadcast %181 : vector<1x256xf32> to vector<16x256xf32>
    %183 = arith.mulf %180, %182 : vector<16x256xf32>
    %184 = arith.truncf %183 : vector<16x256xf32> to vector<16x256xbf16>
    %c112_74 = arith.constant 112 : index
    %c0_75 = arith.constant 0 : index
    %185 = vector.load %arg4[%c112_74, %c0_75] : memref<144x256xbf16, #tpu.memory_space<vmem>>, vector<16x256xbf16>
    tpu.vector_store %arg4[%c112_74, %c0_75], %184 {strides = array<i32>} : memref<144x256xbf16, #tpu.memory_space<vmem>>, vector<16x256xbf16>,
    %c247_i32_76 = arith.constant 247 : i32
    %186 = tpu.dynamic_rotate %138 by %c247_i32_76 dim 1 : vector<16x256xf32>, i32 -> vector<16x256xf32>
    %187 = vector.extract_strided_slice %0 {offsets = [8, 0], sizes = [1, 256], strides = [1, 1]} : vector<9x256xf32> to vector<1x256xf32>
    %188 = vector.broadcast %187 : vector<1x256xf32> to vector<16x256xf32>
    %189 = arith.mulf %186, %188 : vector<16x256xf32>
    %190 = arith.truncf %189 : vector<16x256xf32> to vector<16x256xbf16>
    %c128_77 = arith.constant 128 : index
    %c0_78 = arith.constant 0 : index
    %191 = vector.load %arg4[%c128_77, %c0_78] : memref<144x256xbf16, #tpu.memory_space<vmem>>, vector<16x256xbf16>
    tpu.vector_store %arg4[%c128_77, %c0_78], %190 {strides = array<i32>} : memref<144x256xbf16, #tpu.memory_space<vmem>>, vector<16x256xbf16>,
    %c48_79 = arith.constant 48 : index
    %c0_80 = arith.constant 0 : index
    %192 = vector.load %arg2[%c48_79, %c0_80] : memref<128x256xf32, #tpu.memory_space<vmem>>, vector<16x256xf32>
    %193 = vector.extract_strided_slice %192 {offsets = [0, 0], sizes = [16, 144], strides = [1, 1]} : vector<16x256xf32> to vector<16x144xf32>
    %194 = arith.truncf %193 : vector<16x144xf32> to vector<16x144xbf16>
    %c0_81 = arith.constant 0 : index
    %c0_82 = arith.constant 0 : index
    %195 = vector.load %arg4[%c0_81, %c0_82] : memref<144x256xbf16, #tpu.memory_space<vmem>>, vector<144x256xbf16>
    %cst_83 = arith.constant dense<0.000000e+00> : vector<16x256xf32>
    %196 = tpu.matmul %194, %195, %cst_83 {dimension_numbers = #tpu.dot_dimension_numbers<[1], [0], [0], [1], [0, 0, 1, 1], [], []>} : vector<16x144xbf16>, vector<144x256xbf16>, vector<16x256xf32> -> vector<16x256xf32>
    %197 = vector.extract_strided_slice %192 {offsets = [0, 144], sizes = [16, 1], strides = [1, 1]} : vector<16x256xf32> to vector<16x1xf32>
    %198 = vector.broadcast %197 : vector<16x1xf32> to vector<16x256xf32>
    %199 = arith.addf %196, %198 : vector<16x256xf32>
    %cst_84 = arith.constant 0.000000e+00 : f32
    %200 = vector.broadcast %cst_84 : f32 to vector<16x256xf32>
    %201 = arith.maximumf %199, %200 : vector<16x256xf32>
    %c9_i32_85 = arith.constant 9 : i32
    %202 = tpu.dynamic_rotate %201 by %c9_i32_85 dim 1 : vector<16x256xf32>, i32 -> vector<16x256xf32>
    %203 = vector.extract_strided_slice %0 {offsets = [0, 0], sizes = [1, 256], strides = [1, 1]} : vector<9x256xf32> to vector<1x256xf32>
    %204 = vector.broadcast %203 : vector<1x256xf32> to vector<16x256xf32>
    %205 = arith.mulf %202, %204 : vector<16x256xf32>
    %206 = arith.truncf %205 : vector<16x256xf32> to vector<16x256xbf16>
    %c0_86 = arith.constant 0 : index
    %c0_87 = arith.constant 0 : index
    %207 = vector.load %arg4[%c0_86, %c0_87] : memref<144x256xbf16, #tpu.memory_space<vmem>>, vector<16x256xbf16>
    tpu.vector_store %arg4[%c0_86, %c0_87], %206 {strides = array<i32>} : memref<144x256xbf16, #tpu.memory_space<vmem>>, vector<16x256xbf16>,
    %c8_i32_88 = arith.constant 8 : i32
    %208 = tpu.dynamic_rotate %201 by %c8_i32_88 dim 1 : vector<16x256xf32>, i32 -> vector<16x256xf32>
    %209 = vector.extract_strided_slice %0 {offsets = [1, 0], sizes = [1, 256], strides = [1, 1]} : vector<9x256xf32> to vector<1x256xf32>
    %210 = vector.broadcast %209 : vector<1x256xf32> to vector<16x256xf32>
    %211 = arith.mulf %208, %210 : vector<16x256xf32>
    %212 = arith.truncf %211 : vector<16x256xf32> to vector<16x256xbf16>
    %c16_89 = arith.constant 16 : index
    %c0_90 = arith.constant 0 : index
    %213 = vector.load %arg4[%c16_89, %c0_90] : memref<144x256xbf16, #tpu.memory_space<vmem>>, vector<16x256xbf16>
    tpu.vector_store %arg4[%c16_89, %c0_90], %212 {strides = array<i32>} : memref<144x256xbf16, #tpu.memory_space<vmem>>, vector<16x256xbf16>,
    %c7_i32_91 = arith.constant 7 : i32
    %214 = tpu.dynamic_rotate %201 by %c7_i32_91 dim 1 : vector<16x256xf32>, i32 -> vector<16x256xf32>
    %215 = vector.extract_strided_slice %0 {offsets = [2, 0], sizes = [1, 256], strides = [1, 1]} : vector<9x256xf32> to vector<1x256xf32>
    %216 = vector.broadcast %215 : vector<1x256xf32> to vector<16x256xf32>
    %217 = arith.mulf %214, %216 : vector<16x256xf32>
    %218 = arith.truncf %217 : vector<16x256xf32> to vector<16x256xbf16>
    %c32_92 = arith.constant 32 : index
    %c0_93 = arith.constant 0 : index
    %219 = vector.load %arg4[%c32_92, %c0_93] : memref<144x256xbf16, #tpu.memory_space<vmem>>, vector<16x256xbf16>
    tpu.vector_store %arg4[%c32_92, %c0_93], %218 {strides = array<i32>} : memref<144x256xbf16, #tpu.memory_space<vmem>>, vector<16x256xbf16>,
    %c1_i32_94 = arith.constant 1 : i32
    %220 = tpu.dynamic_rotate %201 by %c1_i32_94 dim 1 : vector<16x256xf32>, i32 -> vector<16x256xf32>
    %221 = vector.extract_strided_slice %0 {offsets = [3, 0], sizes = [1, 256], strides = [1, 1]} : vector<9x256xf32> to vector<1x256xf32>
    %222 = vector.broadcast %221 : vector<1x256xf32> to vector<16x256xf32>
    %223 = arith.mulf %220, %222 : vector<16x256xf32>
    %224 = arith.truncf %223 : vector<16x256xf32> to vector<16x256xbf16>
    %c48_95 = arith.constant 48 : index
    %c0_96 = arith.constant 0 : index
    %225 = vector.load %arg4[%c48_95, %c0_96] : memref<144x256xbf16, #tpu.memory_space<vmem>>, vector<16x256xbf16>
    tpu.vector_store %arg4[%c48_95, %c0_96], %224 {strides = array<i32>} : memref<144x256xbf16, #tpu.memory_space<vmem>>, vector<16x256xbf16>,
    %226 = vector.extract_strided_slice %0 {offsets = [4, 0], sizes = [1, 256], strides = [1, 1]} : vector<9x256xf32> to vector<1x256xf32>
    %227 = vector.broadcast %226 : vector<1x256xf32> to vector<16x256xf32>
    %228 = arith.mulf %201, %227 : vector<16x256xf32>
    %229 = arith.truncf %228 : vector<16x256xf32> to vector<16x256xbf16>
    %c64_97 = arith.constant 64 : index
    %c0_98 = arith.constant 0 : index
    %230 = vector.load %arg4[%c64_97, %c0_98] : memref<144x256xbf16, #tpu.memory_space<vmem>>, vector<16x256xbf16>
    tpu.vector_store %arg4[%c64_97, %c0_98], %229 {strides = array<i32>} : memref<144x256xbf16, #tpu.memory_space<vmem>>, vector<16x256xbf16>,
    %c255_i32_99 = arith.constant 255 : i32
    %231 = tpu.dynamic_rotate %201 by %c255_i32_99 dim 1 : vector<16x256xf32>, i32 -> vector<16x256xf32>
    %232 = vector.extract_strided_slice %0 {offsets = [5, 0], sizes = [1, 256], strides = [1, 1]} : vector<9x256xf32> to vector<1x256xf32>
    %233 = vector.broadcast %232 : vector<1x256xf32> to vector<16x256xf32>
    %234 = arith.mulf %231, %233 : vector<16x256xf32>
    %235 = arith.truncf %234 : vector<16x256xf32> to vector<16x256xbf16>
    %c80_100 = arith.constant 80 : index
    %c0_101 = arith.constant 0 : index
    %236 = vector.load %arg4[%c80_100, %c0_101] : memref<144x256xbf16, #tpu.memory_space<vmem>>, vector<16x256xbf16>
    tpu.vector_store %arg4[%c80_100, %c0_101], %235 {strides = array<i32>} : memref<144x256xbf16, #tpu.memory_space<vmem>>, vector<16x256xbf16>,
    %c249_i32_102 = arith.constant 249 : i32
    %237 = tpu.dynamic_rotate %201 by %c249_i32_102 dim 1 : vector<16x256xf32>, i32 -> vector<16x256xf32>
    %238 = vector.extract_strided_slice %0 {offsets = [6, 0], sizes = [1, 256], strides = [1, 1]} : vector<9x256xf32> to vector<1x256xf32>
    %239 = vector.broadcast %238 : vector<1x256xf32> to vector<16x256xf32>
    %240 = arith.mulf %237, %239 : vector<16x256xf32>
    %241 = arith.truncf %240 : vector<16x256xf32> to vector<16x256xbf16>
    %c96_103 = arith.constant 96 : index
    %c0_104 = arith.constant 0 : index
    %242 = vector.load %arg4[%c96_103, %c0_104] : memref<144x256xbf16, #tpu.memory_space<vmem>>, vector<16x256xbf16>
    tpu.vector_store %arg4[%c96_103, %c0_104], %241 {strides = array<i32>} : memref<144x256xbf16, #tpu.memory_space<vmem>>, vector<16x256xbf16>,
    %c248_i32_105 = arith.constant 248 : i32
    %243 = tpu.dynamic_rotate %201 by %c248_i32_105 dim 1 : vector<16x256xf32>, i32 -> vector<16x256xf32>
    %244 = vector.extract_strided_slice %0 {offsets = [7, 0], sizes = [1, 256], strides = [1, 1]} : vector<9x256xf32> to vector<1x256xf32>
    %245 = vector.broadcast %244 : vector<1x256xf32> to vector<16x256xf32>
    %246 = arith.mulf %243, %245 : vector<16x256xf32>
    %247 = arith.truncf %246 : vector<16x256xf32> to vector<16x256xbf16>
    %c112_106 = arith.constant 112 : index
    %c0_107 = arith.constant 0 : index
    %248 = vector.load %arg4[%c112_106, %c0_107] : memref<144x256xbf16, #tpu.memory_space<vmem>>, vector<16x256xbf16>
    tpu.vector_store %arg4[%c112_106, %c0_107], %247 {strides = array<i32>} : memref<144x256xbf16, #tpu.memory_space<vmem>>, vector<16x256xbf16>,
    %c247_i32_108 = arith.constant 247 : i32
    %249 = tpu.dynamic_rotate %201 by %c247_i32_108 dim 1 : vector<16x256xf32>, i32 -> vector<16x256xf32>
    %250 = vector.extract_strided_slice %0 {offsets = [8, 0], sizes = [1, 256], strides = [1, 1]} : vector<9x256xf32> to vector<1x256xf32>
    %251 = vector.broadcast %250 : vector<1x256xf32> to vector<16x256xf32>
    %252 = arith.mulf %249, %251 : vector<16x256xf32>
    %253 = arith.truncf %252 : vector<16x256xf32> to vector<16x256xbf16>
    %c128_109 = arith.constant 128 : index
    %c0_110 = arith.constant 0 : index
    %254 = vector.load %arg4[%c128_109, %c0_110] : memref<144x256xbf16, #tpu.memory_space<vmem>>, vector<16x256xbf16>
    tpu.vector_store %arg4[%c128_109, %c0_110], %253 {strides = array<i32>} : memref<144x256xbf16, #tpu.memory_space<vmem>>, vector<16x256xbf16>,
    %c64_111 = arith.constant 64 : index
    %c0_112 = arith.constant 0 : index
    %255 = vector.load %arg2[%c64_111, %c0_112] : memref<128x256xf32, #tpu.memory_space<vmem>>, vector<16x256xf32>
    %256 = vector.extract_strided_slice %255 {offsets = [0, 0], sizes = [16, 144], strides = [1, 1]} : vector<16x256xf32> to vector<16x144xf32>
    %257 = arith.truncf %256 : vector<16x144xf32> to vector<16x144xbf16>
    %c0_113 = arith.constant 0 : index
    %c0_114 = arith.constant 0 : index
    %258 = vector.load %arg4[%c0_113, %c0_114] : memref<144x256xbf16, #tpu.memory_space<vmem>>, vector<144x256xbf16>
    %cst_115 = arith.constant dense<0.000000e+00> : vector<16x256xf32>
    %259 = tpu.matmul %257, %258, %cst_115 {dimension_numbers = #tpu.dot_dimension_numbers<[1], [0], [0], [1], [0, 0, 1, 1], [], []>} : vector<16x144xbf16>, vector<144x256xbf16>, vector<16x256xf32> -> vector<16x256xf32>
    %260 = vector.extract_strided_slice %255 {offsets = [0, 144], sizes = [16, 1], strides = [1, 1]} : vector<16x256xf32> to vector<16x1xf32>
    %261 = vector.broadcast %260 : vector<16x1xf32> to vector<16x256xf32>
    %262 = arith.addf %259, %261 : vector<16x256xf32>
    %263 = arith.addf %262, %138 : vector<16x256xf32>
    %cst_116 = arith.constant 0.000000e+00 : f32
    %264 = vector.broadcast %cst_116 : f32 to vector<16x256xf32>
    %265 = arith.maximumf %263, %264 : vector<16x256xf32>
    %c80_117 = arith.constant 80 : index
    %c0_118 = arith.constant 0 : index
    %266 = vector.load %arg2[%c80_117, %c0_118] : memref<128x256xf32, #tpu.memory_space<vmem>>, vector<8x256xf32>
    %267 = vector.extract_strided_slice %266 {offsets = [0, 0], sizes = [8, 16], strides = [1, 1]} : vector<8x256xf32> to vector<8x16xf32>
    %268 = arith.truncf %267 : vector<8x16xf32> to vector<8x16xbf16>
    %269 = arith.truncf %265 : vector<16x256xf32> to vector<16x256xbf16>
    %cst_119 = arith.constant dense<0.000000e+00> : vector<8x256xf32>
    %270 = tpu.matmul %268, %269, %cst_119 {dimension_numbers = #tpu.dot_dimension_numbers<[1], [0], [0], [1], [0, 0, 1, 1], [], []>} : vector<8x16xbf16>, vector<16x256xbf16>, vector<8x256xf32> -> vector<8x256xf32>
    %271 = vector.extract_strided_slice %266 {offsets = [0, 16], sizes = [8, 1], strides = [1, 1]} : vector<8x256xf32> to vector<8x1xf32>
    %272 = vector.broadcast %271 : vector<8x1xf32> to vector<8x256xf32>
    %273 = arith.addf %270, %272 : vector<8x256xf32>
    %cst_120 = arith.constant 0.000000e+00 : f32
    %274 = vector.broadcast %cst_120 : f32 to vector<8x256xf32>
    %275 = arith.maximumf %273, %274 : vector<8x256xf32>
    %c88 = arith.constant 88 : index
    %c0_121 = arith.constant 0 : index
    %276 = vector.load %arg2[%c88, %c0_121] : memref<128x256xf32, #tpu.memory_space<vmem>>, vector<8x256xf32>
    %277 = arith.mulf %275, %276 : vector<8x256xf32>
    %cst_122 = arith.constant dense<0.000000e+00> : vector<256xf32>
    %278 = vector.multi_reduction <add>, %277, %cst_122 [0] : vector<8x256xf32> to vector<256xf32>
    %279 = vector.shape_cast %278 : vector<256xf32> to vector<1x256xf32>
    %c120 = arith.constant 120 : index
    %c0_123 = arith.constant 0 : index
    %280 = vector.load %arg2[%c120, %c0_123] : memref<128x256xf32, #tpu.memory_space<vmem>>, vector<4x256xf32>
    %c96_124 = arith.constant 96 : index
    %c0_125 = arith.constant 0 : index
    %281 = vector.load %arg2[%c96_124, %c0_125] : memref<128x256xf32, #tpu.memory_space<vmem>>, vector<1x256xf32>
    %282 = vector.extract_strided_slice %281 {offsets = [0, 0], sizes = [1, 1], strides = [1, 1]} : vector<1x256xf32> to vector<1x1xf32>
    %283 = vector.broadcast %279 : vector<1x256xf32> to vector<4x256xf32>
    %284 = arith.mulf %280, %283 : vector<4x256xf32>
    %cst_126 = arith.constant dense<0.000000e+00> : vector<4xf32>
    %285 = vector.multi_reduction <add>, %284, %cst_126 [1] : vector<4x256xf32> to vector<4xf32>
    %286 = vector.shape_cast %285 : vector<4xf32> to vector<4x1xf32>
    %287 = vector.broadcast %282 : vector<1x1xf32> to vector<4x1xf32>
    %288 = arith.addf %286, %287 : vector<4x1xf32>
    %289 = math.tanh %288 : vector<4x1xf32>
    %c0_127 = arith.constant 0 : index
    %c0_128 = arith.constant 0 : index
    %c0_129 = arith.constant 0 : index
    %290 = vector.load %arg3[%c0_127, %c0_128, %c0_129] : memref<1x4x1xf32, #tpu.memory_space<vmem>>, vector<1x4x1xf32>
    %291 = vector.shape_cast %290 : vector<1x4x1xf32> to vector<4x1xf32>
    %292 = vector.shape_cast %289 : vector<4x1xf32> to vector<1x4x1xf32>
    tpu.vector_store %arg3[%c0_127, %c0_128, %c0_129], %292 {strides = array<i32>} : memref<1x4x1xf32, #tpu.memory_space<vmem>>, vector<1x4x1xf32>,
    return
  }
  func.func @transform_0(%arg0: i32) -> (i32, i32) {
    %c0_i32 = arith.constant 0 : i32
    %c0_i32_0 = arith.constant 0 : i32
    return %c0_i32, %arg0 : i32, i32
  }
  func.func @transform_1(%arg0: i32) -> (i32, i32) {
    %c0_i32 = arith.constant 0 : i32
    %c0_i32_0 = arith.constant 0 : i32
    %c0_i32_1 = arith.constant 0 : i32
    return %c0_i32, %c0_i32_0 : i32, i32
  }
  func.func @transform_2(%arg0: i32) -> (i32, i32, i32) {
    %c0_i32 = arith.constant 0 : i32
    %c0_i32_0 = arith.constant 0 : i32
    %c0_i32_1 = arith.constant 0 : i32
    return %arg0, %c0_i32, %c0_i32_0 : i32, i32, i32
  }
}

</mosaic_0001>

<bundles_post_ra>
// kernel: forward.1
= control target key start
LH: loop header
LB: loop body
LE: loop exit
PB: predicated region body
PF: predicated region fallthrough
CT: control target
= control target key end

     0   :  { %s2243_s9 = smov 0   ;;  %s3112_s0 = inlined_call_operand.vmem [shape: f32[4,512], index: 0, kind: input, shape index: {}]   ;;  %s3113_s1 = inlined_call_operand.vmem [shape: f32[128,256], index: 1, kind: input, shape index: {}]   ;;  %s3114_s2 = inlined_call_operand.vmem [shape: f32[2,4,1], index: 2, kind: output, shape index: {}]  }
   0x1 LB: > { %s2249_s10 = sadd.s32 4294967295, %s2216_s9   ;;  %p1803_p0 = scmp.ge.s32.totalorder %s2216_s9, 1  ;;  %s2216_s9 = sphi %s2243_s9, %s12_s9  }
   0x2   : > { %p113_p1 = scmp.lt.s32.totalorder %s2216_s9, 3 }
   0x4   : > { %p114_p2 = pnand %p1803_p0, %p113_p1 }
   0x5   : > { %s1804_s11 = sshll.u32 (!%p114_p2), %s2249_s10, 1  ;;  %s2219_s24 = smov (!%p114_p2), 120  }
   0x6   : > { %117 = sbr.rel (%p114_p2) target bundleno = 1834 (0x72a), region = 28  ;;  %p135_p3 = scmp.lt.s32.totalorder (!%p114_p2), %s1804_s11, 3 }
   0x7   : > { %s2220_s25 = smov (!%p114_p2), 121   ;;  %s2221_s26 = smov (!%p114_p2), 127  }
   0x8   : > { %s2222_s27 = smov (!%p114_p2), 1   ;;  %s2223_s28 = smov (!%p114_p2), 7  }
   0x9   : > { %s2224_s29 = smov (!%p114_p2), 8   ;;  %s2225_s30 = smov (!%p114_p2), 9  }
   0xa   : > { %s2226_s3 = smov (!%p114_p2), 119   ;;  %p140_p4 = scmp.lt.s32.totalorder (!%p114_p2), %s2249_s10, 1 }
   0xb   : > { %v149_v0 = vld [vmem:[%s3113_s1] sm:$0xff]  ;;  %v2218_v1 = vmov 4   ;;  %s3116_s11 = smov (!%p135_p3, %s1804_s11), 3  ;;  %v150_v3 = vld [vmem:[%s3113_s1 + $0x10] sm:$0xff]  ;;  %vm175_vm0 = vcmask 1041408   ;;  %vm171_vm1 = vcmask 31744   ;;  %v222_v37 = vlaneseq }
   0xc   : > { %2200 = vset.pattern.permute.xlu0 %v2218_v1  ;;  %s1805_s14 = sshll.u32 %s3116_s11, 2  ;;  %v151_v10 = vpack.c.bf16 %v150_v3, %v149_v0  ;;  %v2266_v12 = vld [vmem:[%s3113_s1 + $0xd0] sm:$0xff]  ;;  %v2271_v13 = vld [vmem:[%s3113_s1 + $0xd8] sm:$0xff]  ;;  %vm534_vm10 = vcmask 130048   ;;  %vm1733_vm11 = vcmask 1043456   ;;  %s3118_s10 = smov (!%p140_p4, %s2249_s10), 1 }
   0xd   : > { %163 = vperm.xlu0 %2200, %v149_v0   ;;  %s138_s17 = scalar_lea.vmem %s3112_s0, %s1805_s14  ;;  %v2274_v18 = vperm.slane %v2266_v12, 4  ;;  %v2277_v19 = vperm.slane %v2271_v13, 4  ;;  %v2359_v39 = vand.u32 127, %v222_v37  ;;  %v2363_v40 = vperm.slane %v2266_v12, 6  ;;  %s1806_s14 = sshll.u32 %s3118_s10, 2 }
   0xe   : > { %v152_v2 = vld [vmem:[%s138_s17] sm:$0xff]  ;;  %v2366_v41 = vperm.slane %v2271_v13, 6  ;;  %v2370_v42 = vperm.slane %v2266_v12, 7  ;;  %v2373_v43 = vperm.slane %v2271_v13, 7  ;;  %v2389_v57 = vperm.slane %v2266_v12, 5  ;;  %s143_s17 = scalar_lea.vmem %s3114_s2, %s1806_s14 }
   0xf   : > { %154 = vst [vmem:[#allocation1] ss:$2 sm:$0xff] %v152_v2  ;;  %vm349_vm2 = vcmp.lt.s32.totalorder %v2359_v39, 121  ;;  %vm372_vm3 = vcmp.lt.s32.totalorder %v2359_v39, 120  ;;  %vm326_vm4 = vcmp.lt.s32.totalorder %v2359_v39, 127  ;;  %v2392_v58 = vperm.slane %v2271_v13, 5 }
  0x10   : > { %vm270_vm5 = vcmp.lt.s32.totalorder %v2359_v39, 7  ;;  %vm293_vm6 = vcmp.lt.s32.totalorder %v2359_v39, 1  ;;  %vm247_vm7 = vcmp.lt.s32.totalorder %v2359_v39, 8  ;;  %vm224_vm8 = vcmp.lt.s32.totalorder %v2359_v39, 9 }
  0x11   : > { %vm395_vm9 = vcmp.lt.s32.totalorder %v2359_v39, 119  ;;  %v1482_v39 = vld [vmem:[%s3113_s1 + $0x90] sm:$0xff]  ;;  %vm1744_vm12 = vcmask 3072  }
  0x15   : > { %168 = vperm.xlu0 %2200, %v150_v3   ;;  %v2402_v3 = vperm.slane %v2266_v12, 2 }
  0x16   : > { %v155_v4 = vld.sshfl [vmem:[#allocation1] sm:$0xff pattern:$0x75316420]  ;;  %v156_v5 = vld.sshfl [vmem:[#allocation1 + $0x8] sm:$0xff pattern:$0x75316420] }
  0x17   : > { %v159_v6 = vpack.c.bf16 %v155_v4, %v155_v4  ;;  %v160_v7 = vpack.c.bf16 %v156_v5, %v156_v5  ;;  %v2405_v4 = vperm.slane %v2271_v13, 2  ;;  %v2409_v5 = vperm.slane %v2266_v12, 3 }
  0x19   : > { %v177_v8 = vsel %vm175_vm0, %v159_v6, 0  ;;  %v180_v9 = vsel %vm175_vm0, %v160_v7, 0  ;;  %v2412_v6 = vperm.slane %v2271_v13, 3 }
  0x1a   : > { %189 = vmatpush.bf16.msra.mxu0 %v177_v8  ;;  %203 = vmatpush.bf16.msra.mxu1 %v180_v9 }
  0x1d   : > { %1807 = vmatmul.msk.bf16.vlgmr.msra.gmra.mxu0 %vm171_vm1, %v151_v10  ;;  %1808 = vmatmul.msk.bf16.vlgmr.msra.gmra.mxu1 %vm171_vm1, %v151_v10 }
  0x7f   : > { %v164_v11 = vpop.permute.xlu0 %163 }
  0x87   : > { %v169_v24 = vpop.permute.xlu0 %168 }
  0x9a   : > { %v191_v14 = vpop.f32.mrf.mxu0  ;;  %v205_v15 = vpop.f32.mrf.mxu1 }
  0x9b   : > { %v192_v16 = vadd.f32 %v191_v14, %v164_v11  ;;  %v206_v17 = vadd.f32 %v205_v15, %v164_v11 }
  0x9d   : > { %v2279_v20 = vmax.f32 %v192_v16, 0.0  ;;  %v2281_v21 = vmax.f32 %v206_v17, 0.0 }
  0x9f   : > { %368 = vrot.lane.b32.xlu2 %v2281_v21, %s2219_s24  ;;  %341 = vrot.lane.b32.xlu0 %v2279_v20, %s2220_s25  ;;  %v310_v22 = vmul.f32 %v2274_v18, %v2279_v20  ;;  %v311_v23 = vmul.f32 %v2277_v19, %v2281_v21 }
  0xa0   : > { %364 = vrot.lane.b32.xlu1 %v2279_v20, %s2219_s24 }
  0xa1   : > { %v314_v25 = vpack.c.bf16 %v311_v23, %v310_v22 }
  0xa2   : > { %v193_v26 = vpop.f32.mrf.mxu0  ;;  %v207_v27 = vpop.f32.mrf.mxu1 }
  0xa3   : > { %v194_v28 = vadd.f32 %v193_v26, %v169_v24  ;;  %v208_v29 = vadd.f32 %v207_v27, %v169_v24  ;;  %316 = vst [vmem:[#allocation2 + $0x40] sm:$0xff] %v314_v25  ;;  %v2428_v26 = vperm.slane %v2266_v12, 1  ;;  %v2431_v27 = vperm.slane %v2271_v13, 1 }
  0xa5   : > { %v2293_v30 = vmax.f32 %v194_v28, 0.0  ;;  %v2295_v31 = vmax.f32 %v208_v29, 0.0 }
  0xa7   : > { %345 = vrot.lane.b32.xlu2 %v2281_v21, %s2220_s25  ;;  %322 = vrot.lane.b32.xlu0 %v2281_v21, %s2221_s26  ;;  %v312_v32 = vmul.f32 %v2274_v18, %v2293_v30  ;;  %v313_v33 = vmul.f32 %v2277_v19, %v2295_v31 }
  0xa8   : > { %318 = vrot.lane.b32.xlu1 %v2279_v20, %s2221_s26 }
  0xa9   : > { %v315_v34 = vpack.c.bf16 %v313_v33, %v312_v32 }
  0xab   : > { %317 = vst [vmem:[#allocation2 + $0x48] sm:$0xff] %v315_v34 }
  0xaf   : > { %285 = vrot.lane.b32.xlu2 %v2279_v20, %s2222_s27  ;;  %262 = vrot.lane.b32.xlu0 %v2279_v20, %s2223_s28 }
  0xb0   : > { %289 = vrot.lane.b32.xlu1 %v2281_v21, %s2222_s27 }
  0xb7   : > { %266 = vrot.lane.b32.xlu2 %v2281_v21, %s2223_s28  ;;  %243 = vrot.lane.b32.xlu0 %v2281_v21, %s2224_s29 }
  0xb8   : > { %239 = vrot.lane.b32.xlu1 %v2279_v20, %s2224_s29 }
  0xbf   : > { %214 = vrot.lane.b32.xlu2 %v2279_v20, %s2225_s30  ;;  %387 = vrot.lane.b32.xlu0 %v2279_v20, %s2226_s3 }
  0xc0   : > { %218 = vrot.lane.b32.xlu1 %v2281_v21, %s2225_s30 }
  0xc7   : > { %370 = vrot.lane.b32.xlu2 %v2295_v31, %s2219_s24  ;;  %347 = vrot.lane.b32.xlu0 %v2295_v31, %s2220_s25 }
  0xc8   : > { %366 = vrot.lane.b32.xlu1 %v2293_v30, %s2219_s24 }
  0xcf   : > { %320 = vrot.lane.b32.xlu2 %v2293_v30, %s2221_s26  ;;  %287 = vrot.lane.b32.xlu0 %v2293_v30, %s2222_s27 }
  0xd0   : > { %343 = vrot.lane.b32.xlu1 %v2293_v30, %s2220_s25 }
  0xd7   : > { %291 = vrot.lane.b32.xlu2 %v2295_v31, %s2222_s27  ;;  %268 = vrot.lane.b32.xlu0 %v2295_v31, %s2223_s28 }
  0xd8   : > { %324 = vrot.lane.b32.xlu1 %v2295_v31, %s2221_s26 }
  0xdf   : > { %241 = vrot.lane.b32.xlu2 %v2293_v30, %s2224_s29  ;;  %216 = vrot.lane.b32.xlu0 %v2293_v30, %s2225_s30 }
  0xe0   : > { %264 = vrot.lane.b32.xlu1 %v2293_v30, %s2223_s28 }
  0xe7   : > { %220 = vrot.lane.b32.xlu2 %v2295_v31, %s2225_s30  ;;  %393 = vrot.lane.b32.xlu0 %v2295_v31, %s2226_s3 }
  0xe8   : > { %245 = vrot.lane.b32.xlu1 %v2295_v31, %s2224_s29 }
  0xef   : > { %391 = vrot.lane.b32.xlu2 %v2281_v21, %s2226_s3 }
  0xf0   : > { %389 = vrot.lane.b32.xlu1 %v2293_v30, %s2226_s3 }
  0xf9   : > { %v369_v35 = vpop.permute.xlu2 %368 }
 0x101   : > { %v346_v36 = vpop.permute.xlu2 %345 }
 0x109   : > { %v286_v38 = vpop.permute.xlu2 %285 }
 0x111   : > { %v267_v44 = vpop.permute.xlu2 %266  ;;  %v342_v45 = vpop.permute.xlu0 %341 }
 0x112   : > { %v350_v46 = vsel %vm349_vm2, %v342_v45, %v346_v36  ;;  %v352_v47 = vsel %vm349_vm2, %v346_v36, %v342_v45  ;;  %v365_v48 = vpop.permute.xlu1 %364 }
 0x113   : > { %v356_v49 = vmul.f32 %v2363_v40, %v350_v46  ;;  %v357_v50 = vmul.f32 %v2366_v41, %v352_v47  ;;  %v373_v51 = vsel %vm372_vm3, %v365_v48, %v369_v35  ;;  %v375_v52 = vsel %vm372_vm3, %v369_v35, %v365_v48 }
 0x114   : > { %v379_v53 = vmul.f32 %v2370_v42, %v373_v51  ;;  %v380_v54 = vmul.f32 %v2373_v43, %v375_v52 }
 0x115   : > { %v360_v55 = vpack.c.bf16 %v357_v50, %v356_v49 }
 0x116   : > { %v383_v56 = vpack.c.bf16 %v380_v54, %v379_v53 }
 0x117   : > { %362 = vst [vmem:[#allocation2 + $0x60] sm:$0xff] %v360_v55 }
 0x118   : > { %385 = vst [vmem:[#allocation2 + $0x70] sm:$0xff] %v383_v56 }
 0x119   : > { %v215_v59 = vpop.permute.xlu2 %214  ;;  %v323_v60 = vpop.permute.xlu0 %322 }
 0x11a   : > { %v319_v61 = vpop.permute.xlu1 %318 }
 0x11b   : > { %v327_v62 = vsel %vm326_vm4, %v319_v61, %v323_v60  ;;  %v329_v63 = vsel %vm326_vm4, %v323_v60, %v319_v61 }
 0x11c   : > { %v333_v0 = vmul.f32 %v2389_v57, %v327_v62  ;;  %v334_v1 = vmul.f32 %v2392_v58, %v329_v63 }
 0x11e   : > { %v337_v2 = vpack.c.bf16 %v334_v1, %v333_v0 }
 0x120   : > { %339 = vst [vmem:[#allocation2 + $0x50] sm:$0xff] %v337_v2 }
 0x121   : > { %v371_v7 = vpop.permute.xlu2 %370  ;;  %v263_v8 = vpop.permute.xlu0 %262 }
 0x122   : > { %v271_v9 = vsel %vm270_vm5, %v263_v8, %v267_v44  ;;  %v273_v10 = vsel %vm270_vm5, %v267_v44, %v263_v8  ;;  %v290_v11 = vpop.permute.xlu1 %289  ;;  %v2446_v44 = vperm.slane %v2271_v13, 0 }
 0x123   : > { %v277_v14 = vmul.f32 %v2402_v3, %v273_v10  ;;  %v278_v15 = vmul.f32 %v2405_v4, %v271_v9  ;;  %v294_v16 = vsel %vm293_vm6, %v286_v38, %v290_v11  ;;  %v296_v17 = vsel %vm293_vm6, %v290_v11, %v286_v38 }
 0x124   : > { %v300_v22 = vmul.f32 %v2409_v5, %v296_v17  ;;  %v301_v23 = vmul.f32 %v2412_v6, %v294_v16  ;;  %v2443_v38 = vperm.slane %v2266_v12, 0  ;;  %v2477_v17 = vld [vmem:[%s3113_s1 + $0xe0] ss:$0 sm:$0xff] }
 0x125   : > { %v281_v24 = vpack.c.bf16 %v278_v15, %v277_v14  ;;  %v1867_v15 = vld [vmem:[#allocation2 + $0x70] sm:$0xf] }
 0x126   : > { %v304_v25 = vpack.c.bf16 %v301_v23, %v300_v22  ;;  %v2482_v22 = vld [vmem:[%s3113_s1 + $0xe8] ss:$0 sm:$0xff]  ;;  %v2124_v23 = vld [vmem:[#allocation2 + $0x74] sm:$0xf] }
 0x127   : > { %283 = vst [vmem:[#allocation2 + $0x20] sm:$0xff] %v281_v24 }
 0x128   : > { %306 = vst [vmem:[#allocation2 + $0x30] sm:$0xff] %v304_v25 }
 0x129   : > { %v2433_v28 = vpop.permute.xlu2 %320  ;;  %v244_v29 = vpop.permute.xlu0 %243 }
 0x12a   : > { %v240_v32 = vpop.permute.xlu1 %239 }
 0x12b   : > { %v248_v33 = vsel %vm247_vm7, %v240_v32, %v244_v29  ;;  %v250_v34 = vsel %vm247_vm7, %v244_v29, %v240_v32 }
 0x12c   : > { %v254_v35 = vmul.f32 %v2428_v26, %v250_v34  ;;  %v255_v36 = vmul.f32 %v2431_v27, %v248_v33 }
 0x12e   : > { %v258_v37 = vpack.c.bf16 %v255_v36, %v254_v35 }
 0x130   : > { %260 = vst [vmem:[#allocation2 + $0x10] sm:$0xff] %v258_v37 }
 0x131   : > { %v292_v45 = vpop.permute.xlu2 %291  ;;  %v388_v46 = vpop.permute.xlu0 %387 }
 0x132   : > { %v219_v47 = vpop.permute.xlu1 %218 }
 0x133   : > { %v225_v48 = vsel %vm224_vm8, %v215_v59, %v219_v47  ;;  %v227_v49 = vsel %vm224_vm8, %v219_v47, %v215_v59 }
 0x134   : > { %v231_v50 = vmul.f32 %v2443_v38, %v227_v49  ;;  %v232_v51 = vmul.f32 %v2446_v44, %v225_v48 }
 0x136   : > { %v235_v52 = vpack.c.bf16 %v232_v51, %v231_v50 }
 0x138   : > { %237 = vst [vmem:[#allocation2] sm:$0xff] %v235_v52 }
 0x139   : > { %v2454_v12 = vpop.permute.xlu2 %241  ;;  %v348_v53 = vpop.permute.xlu0 %347 }
 0x13a   : > { %v367_v13 = vpop.permute.xlu1 %366 }
 0x13b   : > { %v374_v54 = vsel %vm372_vm3, %v367_v13, %v371_v7  ;;  %v376_v55 = vsel %vm372_vm3, %v371_v7, %v367_v13  ;;  %v2122_v13 = vld [vmem:[#allocation2 + $0x64] sm:$0xf] }
 0x13c   : > { %v381_v56 = vmul.f32 %v2370_v42, %v374_v54  ;;  %v382_v59 = vmul.f32 %v2373_v43, %v376_v55 }
 0x13e   : > { %v384_v60 = vpack.c.bf16 %v382_v59, %v381_v56 }
 0x140   : > { %386 = vst [vmem:[#allocation2 + $0x78] sm:$0xff] %v384_v60 }
 0x141   : > { %v221_v61 = vpop.permute.xlu2 %220  ;;  %v288_v62 = vpop.permute.xlu0 %287 }
 0x142   : > { %v295_v63 = vsel %vm293_vm6, %v288_v62, %v292_v45  ;;  %v297_v0 = vsel %vm293_vm6, %v292_v45, %v288_v62  ;;  %v344_v1 = vpop.permute.xlu1 %343 }
 0x143   : > { %v302_v2 = vmul.f32 %v2409_v5, %v297_v0  ;;  %v303_v8 = vmul.f32 %v2412_v6, %v295_v63  ;;  %v351_v7 = vsel %vm349_vm2, %v344_v1, %v348_v53  ;;  %v353_v9 = vsel %vm349_vm2, %v348_v53, %v344_v1  ;;  %v1859_v53 = vld [vmem:[#allocation2 + $0x60] sm:$0xf] }
 0x144   : > { %v358_v10 = vmul.f32 %v2363_v40, %v351_v7  ;;  %v359_v11 = vmul.f32 %v2366_v41, %v353_v9 }
 0x145   : > { %v305_v14 = vpack.c.bf16 %v303_v8, %v302_v2 }
 0x146   : > { %v361_v16 = vpack.c.bf16 %v359_v11, %v358_v10  ;;  %v1851_v11 = vld [vmem:[#allocation2 + $0x50] sm:$0xf] }
 0x147   : > { %307 = vst [vmem:[#allocation2 + $0x38] sm:$0xff] %v305_v14  ;;  %v2125_v24 = vld [vmem:[#allocation2 + $0x74] sm:$0xf0]  ;;  %v1869_v25 = vld [vmem:[#allocation2 + $0x78] sm:$0xf0] }
 0x148   : > { %363 = vst [vmem:[#allocation2 + $0x68] sm:$0xff] %v361_v16  ;;  %v1868_v29 = vor.u32 %v2125_v24, %v1867_v15  ;;  %v1872_v32 = vor.u32 %v2124_v23, %v1869_v25  ;;  %v2120_v14 = vld [vmem:[#allocation2 + $0x54] sm:$0xf]  ;;  %v2514_v15 = vld [vmem:[%s3113_s1 + $0x28] sm:$0xff]  ;;  %v2227_v23 = vmov 16  }
 0x149   : > { %v392_v33 = vpop.permute.xlu2 %391  ;;  %v269_v34 = vpop.permute.xlu0 %268  ;;  %v2519_v16 = vld [vmem:[%s3113_s1 + $0x38] sm:$0xff]  ;;  %2201 = vset.pattern.permute.xlu1 %v2227_v23  ;;  %2202 = vset.pattern.permute.xlu2 %v2227_v23 }
 0x14a   : > { %v396_v35 = vsel %vm395_vm9, %v388_v46, %v392_v33  ;;  %v398_v36 = vsel %vm395_vm9, %v392_v33, %v388_v46  ;;  %538 = vmatpush.bf16.msra.mxu2 %v1868_v29  ;;  %566 = vmatpush.bf16.msrb.mxu0 %v1872_v32  ;;  %v325_v37 = vpop.permute.xlu1 %324  ;;  %v2119_v33 = vld [vmem:[#allocation2 + $0x44] sm:$0xf0] }
 0x14b   : > { %v402_v45 = vmul.f32 %v2477_v17, %v396_v35  ;;  %v403_v47 = vmul.f32 %v2482_v22, %v398_v36  ;;  %v328_v48 = vsel %vm326_vm4, %v2433_v28, %v325_v37  ;;  %v330_v49 = vsel %vm326_vm4, %v325_v37, %v2433_v28  ;;  %436 = vperm.xlu1 %2201, %v2514_v15  }
 0x14c   : > { %v335_v50 = vmul.f32 %v2389_v57, %v328_v48  ;;  %v336_v51 = vmul.f32 %v2392_v58, %v330_v49  ;;  %441 = vperm.xlu2 %2202, %v2519_v16   ;;  %2203 = vset.pattern.permute.xlu0 %v2227_v23 }
 0x14d   : > { %v406_v46 = vpack.c.bf16 %v403_v47, %v402_v45  ;;  %v1843_v45 = vld [vmem:[#allocation2 + $0x40] sm:$0xf]  ;;  %v2118_v47 = vld [vmem:[#allocation2 + $0x44] sm:$0xf] }
 0x14e   : > { %v338_v52 = vpack.c.bf16 %v336_v51, %v335_v50  ;;  %v1844_v50 = vor.u32 %v2119_v33, %v1843_v45  ;;  %v410_v33 = vld [vmem:[%s3113_s1 + $0x20] sm:$0xff] }
 0x14f   : > { %408 = vst [vmem:[#allocation2 + $0x80] sm:$0xff] %v406_v46  ;;  %v2123_v54 = vld [vmem:[#allocation2 + $0x64] sm:$0xf0]  ;;  %v1861_v55 = vld [vmem:[#allocation2 + $0x68] sm:$0xf0] }
 0x150   : > { %340 = vst [vmem:[#allocation2 + $0x58] sm:$0xff] %v338_v52  ;;  %v1860_v56 = vor.u32 %v2123_v54, %v1859_v53  ;;  %v1864_v59 = vor.u32 %v2122_v13, %v1861_v55  ;;  %v2117_v46 = vld [vmem:[#allocation2 + $0x34] sm:$0xf0]  ;;  %v1837_v52 = vld [vmem:[#allocation2 + $0x38] sm:$0xf0] }
 0x151   : > { %v217_v60 = vpop.permute.xlu0 %216  ;;  %v1835_v13 = vld [vmem:[#allocation2 + $0x30] sm:$0xf]  ;;  %v2116_v54 = vld [vmem:[#allocation2 + $0x34] sm:$0xf] }
 0x152   : > { %v226_v62 = vsel %vm224_vm8, %v217_v60, %v221_v61  ;;  %v228_v28 = vsel %vm224_vm8, %v221_v61, %v217_v60  ;;  %539 = vmatpush.bf16.msra.mxu2 %v1860_v56  ;;  %567 = vmatpush.bf16.msrb.mxu0 %v1864_v59  ;;  %v265_v63 = vpop.permute.xlu1 %264  ;;  %v1836_v55 = vor.u32 %v2117_v46, %v1835_v13 }
 0x153   : > { %v233_v0 = vmul.f32 %v2443_v38, %v228_v28  ;;  %v234_v1 = vmul.f32 %v2446_v44, %v226_v62  ;;  %v272_v2 = vsel %vm270_vm5, %v265_v63, %v269_v34  ;;  %v274_v8 = vsel %vm270_vm5, %v269_v34, %v265_v63  ;;  %v1845_v34 = vld [vmem:[#allocation2 + $0x48] sm:$0xf0] }
 0x154   : > { %v279_v7 = vmul.f32 %v2402_v3, %v274_v8  ;;  %v280_v9 = vmul.f32 %v2405_v4, %v272_v2  ;;  %v1848_v51 = vor.u32 %v2118_v47, %v1845_v34  ;;  %v1840_v56 = vor.u32 %v2116_v54, %v1837_v52  ;;  %v412_v34 = vld [vmem:[%s3113_s1 + $0x30] sm:$0xff] }
 0x155   : > { %v236_v10 = vpack.c.bf16 %v234_v1, %v233_v0  ;;  %v1827_v0 = vld [vmem:[#allocation2 + $0x20] sm:$0xf]  ;;  %v2114_v1 = vld [vmem:[#allocation2 + $0x24] sm:$0xf]  ;;  %v414_v47 = vpack.c.bf16 %v412_v34, %v410_v33 }
 0x156   : > { %v282_v61 = vpack.c.bf16 %v280_v9, %v279_v7  ;;  %v767_v34 = vld [vmem:[%s3113_s1 + $0x48] sm:$0xff] }
 0x157   : > { %238 = vst [vmem:[#allocation2 + $0x8] sm:$0xff] %v236_v10  ;;  %v2121_v24 = vld [vmem:[#allocation2 + $0x54] sm:$0xf0]  ;;  %v1853_v25 = vld [vmem:[#allocation2 + $0x58] sm:$0xf0] }
 0x158   : > { %284 = vst [vmem:[#allocation2 + $0x28] sm:$0xff] %v282_v61  ;;  %v1852_v29 = vor.u32 %v2121_v24, %v1851_v11  ;;  %v1856_v32 = vor.u32 %v2120_v14, %v1853_v25  ;;  %v1819_v11 = vld [vmem:[#allocation2 + $0x10] sm:$0xf]  ;;  %v2112_v14 = vld [vmem:[#allocation2 + $0x14] sm:$0xf] }
 0x159   : > { %v394_v60 = vpop.permute.xlu0 %393 }
 0x15a   : > { %540 = vmatpush.bf16.msra.mxu2 %v1852_v29  ;;  %568 = vmatpush.bf16.msrb.mxu0 %v1856_v32  ;;  %v246_v35 = vpop.permute.xlu1 %245 }
 0x15b   : > { %v249_v36 = vsel %vm247_vm7, %v2454_v12, %v246_v35  ;;  %v251_v37 = vsel %vm247_vm7, %v246_v35, %v2454_v12  ;;  %v1811_v35 = vld [vmem:[#allocation2] sm:$0xf] }
 0x15c   : > { %v256_v48 = vmul.f32 %v2428_v26, %v251_v37  ;;  %v257_v49 = vmul.f32 %v2431_v27, %v249_v36  ;;  %v2110_v36 = vld [vmem:[#allocation2 + $0x4] sm:$0xf] }
 0x15e   : > { %v259_v53 = vpack.c.bf16 %v257_v49, %v256_v48  ;;  %541 = vmatpush.bf16.msra.mxu2 %v1844_v50  ;;  %569 = vmatpush.bf16.msrb.mxu0 %v1848_v51  ;;  %v2111_v29 = vld [vmem:[#allocation2 + $0x4] sm:$0xf0]  ;;  %v1813_v32 = vld [vmem:[#allocation2 + $0x8] sm:$0xf0]  ;;  %v1875_v48 = vld [vmem:[#allocation2 + $0x80] sm:$0xf] }
 0x15f   : > { %v2115_v59 = vld [vmem:[#allocation2 + $0x24] sm:$0xf0]  ;;  %v1829_v12 = vld [vmem:[#allocation2 + $0x28] sm:$0xf0]  ;;  %v1812_v37 = vor.u32 %v2111_v29, %v1811_v35  ;;  %v1816_v45 = vor.u32 %v2110_v36, %v1813_v32  ;;  %v2126_v50 = vld [vmem:[#allocation2 + $0x84] sm:$0xf] }
 0x160   : > { %261 = vst [vmem:[#allocation2 + $0x18] sm:$0xff] %v259_v53  ;;  %v1828_v7 = vor.u32 %v2115_v59, %v1827_v0  ;;  %v1832_v9 = vor.u32 %v2114_v1, %v1829_v12  ;;  %v415_v53 = vpack.c.bf16 %v2519_v16, %v2514_v15  ;;  %v769_v35 = vld [vmem:[%s3113_s1 + $0x58] sm:$0xff] }
 0x161   : > { %v2578_v36 = vpack.c.bf16 %v769_v35, %v767_v34 }
 0x162   : > { %v390_v62 = vpop.permute.xlu1 %389  ;;  %542 = vmatpush.bf16.msra.mxu2 %v1836_v55  ;;  %570 = vmatpush.bf16.msrb.mxu0 %v1840_v56 }
 0x163   : > { %v397_v28 = vsel %vm395_vm9, %v390_v62, %v394_v60  ;;  %v399_v63 = vsel %vm395_vm9, %v394_v60, %v390_v62 }
 0x164   : > { %v404_v2 = vmul.f32 %v2477_v17, %v397_v28  ;;  %v405_v8 = vmul.f32 %v2482_v22, %v399_v63 }
 0x166   : > { %v407_v10 = vpack.c.bf16 %v405_v8, %v404_v2  ;;  %543 = vmatpush.bf16.msra.mxu2 %v1828_v7  ;;  %571 = vmatpush.bf16.msrb.mxu0 %v1832_v9 }
 0x167   : > { %v2113_v61 = vld [vmem:[#allocation2 + $0x14] sm:$0xf0]  ;;  %v1821_v23 = vld [vmem:[#allocation2 + $0x18] sm:$0xf0] }
 0x168   : > { %409 = vst [vmem:[#allocation2 + $0x88] sm:$0xff] %v407_v10  ;;  %v1820_v24 = vor.u32 %v2113_v61, %v1819_v11  ;;  %v1824_v25 = vor.u32 %v2112_v14, %v1821_v23 }
 0x16a   : > { %544 = vmatpush.bf16.msra.mxu2 %v1820_v24  ;;  %572 = vmatpush.bf16.msrb.mxu0 %v1824_v25 }
 0x16e   : > { %545 = vmatpush.bf16.msra.mxu2 %v1812_v37  ;;  %573 = vmatpush.bf16.msrb.mxu0 %v1816_v45 }
 0x16f   : > { %v2127_v49 = vld [vmem:[#allocation2 + $0x84] sm:$0xf0]  ;;  %v1877_v51 = vld [vmem:[#allocation2 + $0x88] sm:$0xf0] }
 0x170   : > { %v1876_v46 = vor.u32 %v2127_v49, %v1875_v48  ;;  %v1880_v52 = vor.u32 %v2126_v50, %v1877_v51 }
 0x171   : > { %546 = vmatmul.bf16.vlgmr.msra.gmra.mxu2 %v414_v47  ;;  %574 = vmatmul.bf16.vlgmr.msrb.gmra.mxu0 %v414_v47 }
 0x172   : > { %559 = vmatpush.bf16.msra.mxu3 %v1876_v46  ;;  %587 = vmatpush.bf16.msrb.mxu1 %v1880_v52 }
 0x175   : > { %1881 = vmatmul.msk.bf16.vlgmr.msra.gmra.mxu3 %vm534_vm10, %v415_v53  ;;  %1882 = vmatmul.msk.bf16.vlgmr.msrb.gmra.mxu1 %vm534_vm10, %v415_v53 }
 0x1a6   : > { %v442_v28 = vpop.permute.xlu2 %441 }
 0x1bd   : > { %v437_v13 = vpop.permute.xlu1 %436 }
 0x1ee   : > { %v575_v54 = vpop.f32.mrf.mxu0 }
 0x1ef   : > { %v576_v55 = vadd.f32 %v575_v54, %v437_v13 }
 0x1f2   : > { %v589_v56 = vpop.f32.mrf.mxu1 }
 0x1f3   : > { %v590_v59 = vadd.f32 %v589_v56, %v576_v55 }
 0x1f4   : > { %v547_v12 = vpop.f32.mrf.mxu2 }
 0x1f5   : > { %v595_v60 = vmax.f32 %v590_v59, 0.0  ;;  %v548_v62 = vadd.f32 %v547_v12, %v437_v13 }
 0x1f6   : > { %v577_v15 = vpop.f32.mrf.mxu0 }
 0x1f7   : > { %690 = vrot.lane.b32.xlu1 %v595_v60, %s2221_s26  ;;  %710 = vrot.lane.b32.xlu0 %v595_v60, %s2220_s25  ;;  %v578_v1 = vadd.f32 %v577_v15, %v442_v28  ;;  %v679_v7 = vmul.f32 %v595_v60, %v2277_v19 }
 0x1f8   : > { %730 = vrot.lane.b32.xlu2 %v595_v60, %s2219_s24  ;;  %v561_v16 = vpop.f32.mrf.mxu3 }
 0x1f9   : > { %v562_v63 = vadd.f32 %v561_v16, %v548_v62 }
 0x1fa   : > { %v591_v0 = vpop.f32.mrf.mxu1 }
 0x1fb   : > { %v594_v2 = vmax.f32 %v562_v63, 0.0  ;;  %v592_v10 = vadd.f32 %v591_v0, %v578_v1 }
 0x1fc   : > { %v549_v8 = vpop.f32.mrf.mxu2 }
 0x1fd   : > { %v678_v9 = vmul.f32 %v594_v2, %v2274_v18  ;;  %v550_v11 = vadd.f32 %v549_v8, %v442_v28  ;;  %v597_v23 = vmax.f32 %v592_v10, 0.0 }
 0x1ff   : > { %706 = vrot.lane.b32.xlu1 %v594_v2, %s2220_s25  ;;  %642 = vrot.lane.b32.xlu0 %v595_v60, %s2223_s28  ;;  %v682_v61 = vpack.c.bf16 %v679_v7, %v678_v9  ;;  %v681_v29 = vmul.f32 %v597_v23, %v2277_v19 }
 0x200   : > { %662 = vrot.lane.b32.xlu2 %v595_v60, %s2222_s27  ;;  %v563_v14 = vpop.f32.mrf.mxu3 }
 0x201   : > { %v564_v24 = vadd.f32 %v563_v14, %v550_v11  ;;  %684 = vst [vmem:[#allocation2 + $0x40] sm:$0xff] %v682_v61 }
 0x203   : > { %v596_v25 = vmax.f32 %v564_v24, 0.0 }
 0x205   : > { %v680_v32 = vmul.f32 %v596_v25, %v2274_v18 }
 0x207   : > { %638 = vrot.lane.b32.xlu1 %v594_v2, %s2223_s28  ;;  %726 = vrot.lane.b32.xlu0 %v594_v2, %s2219_s24  ;;  %v683_v33 = vpack.c.bf16 %v681_v29, %v680_v32 }
 0x208   : > { %686 = vrot.lane.b32.xlu2 %v594_v2, %s2221_s26 }
 0x209   : > { %685 = vst [vmem:[#allocation2 + $0x48] sm:$0xff] %v683_v33 }
 0x20f   : > { %712 = vrot.lane.b32.xlu1 %v597_v23, %s2220_s25  ;;  %658 = vrot.lane.b32.xlu0 %v594_v2, %s2222_s27 }
 0x210   : > { %618 = vrot.lane.b32.xlu2 %v594_v2, %s2224_s29 }
 0x217   : > { %644 = vrot.lane.b32.xlu1 %v597_v23, %s2223_s28  ;;  %732 = vrot.lane.b32.xlu0 %v597_v23, %s2219_s24 }
 0x218   : > { %692 = vrot.lane.b32.xlu2 %v597_v23, %s2221_s26 }
 0x21f   : > { %728 = vrot.lane.b32.xlu1 %v596_v25, %s2219_s24  ;;  %664 = vrot.lane.b32.xlu0 %v597_v23, %s2222_s27 }
 0x220   : > { %708 = vrot.lane.b32.xlu2 %v596_v25, %s2220_s25 }
 0x227   : > { %622 = vrot.lane.b32.xlu1 %v595_v60, %s2224_s29  ;;  %688 = vrot.lane.b32.xlu0 %v596_v25, %s2221_s26 }
 0x228   : > { %624 = vrot.lane.b32.xlu2 %v597_v23, %s2224_s29 }
 0x22f   : > { %660 = vrot.lane.b32.xlu1 %v596_v25, %s2222_s27  ;;  %598 = vrot.lane.b32.xlu0 %v594_v2, %s2225_s30 }
 0x230   : > { %640 = vrot.lane.b32.xlu2 %v596_v25, %s2223_s28 }
 0x237   : > { %746 = vrot.lane.b32.xlu1 %v594_v2, %s2226_s3  ;;  %620 = vrot.lane.b32.xlu0 %v596_v25, %s2224_s29 }
 0x238   : > { %602 = vrot.lane.b32.xlu2 %v595_v60, %s2225_s30 }
 0x23f   : > { %600 = vrot.lane.b32.xlu1 %v596_v25, %s2225_s30  ;;  %604 = vrot.lane.b32.xlu0 %v597_v23, %s2225_s30 }
 0x240   : > { %748 = vrot.lane.b32.xlu2 %v596_v25, %s2226_s3 }
 0x247   : > { %752 = vrot.lane.b32.xlu1 %v597_v23, %s2226_s3  ;;  %750 = vrot.lane.b32.xlu0 %v595_v60, %s2226_s3 }
 0x248   : > { %792 = vperm.xlu2 %2202, %v767_v34  }
 0x24f   : > { %797 = vperm.xlu0 %2203, %v769_v35  }
 0x252   : > { %v731_v37 = vpop.permute.xlu2 %730 }
 0x25a   : > { %v663_v45 = vpop.permute.xlu2 %662 }
 0x262   : > { %v687_v47 = vpop.permute.xlu2 %686 }
 0x269   : > { %v691_v48 = vpop.permute.xlu1 %690  ;;  %v711_v49 = vpop.permute.xlu0 %710 }
 0x26a   : > { %v694_v50 = vsel %vm326_vm4, %v687_v47, %v691_v48  ;;  %v696_v51 = vsel %vm326_vm4, %v691_v48, %v687_v47  ;;  %v2595_v46 = vpop.permute.xlu2 %618 }
 0x26b   : > { %v698_v52 = vmul.f32 %v694_v50, %v2389_v57  ;;  %v699_v53 = vmul.f32 %v696_v51, %v2392_v58 }
 0x26d   : > { %v702_v13 = vpack.c.bf16 %v699_v53, %v698_v52 }
 0x26f   : > { %704 = vst [vmem:[#allocation2 + $0x50] sm:$0xff] %v702_v13 }
 0x271   : > { %v707_v54 = vpop.permute.xlu1 %706  ;;  %v643_v55 = vpop.permute.xlu0 %642 }
 0x272   : > { %v714_v56 = vsel %vm349_vm2, %v707_v54, %v711_v49  ;;  %v716_v59 = vsel %vm349_vm2, %v711_v49, %v707_v54  ;;  %v693_v12 = vpop.permute.xlu2 %692 }
 0x273   : > { %v718_v60 = vmul.f32 %v714_v56, %v2363_v40  ;;  %v719_v62 = vmul.f32 %v716_v59, %v2366_v41 }
 0x275   : > { %v722_v28 = vpack.c.bf16 %v719_v62, %v718_v60 }
 0x277   : > { %724 = vst [vmem:[#allocation2 + $0x60] sm:$0xff] %v722_v28 }
 0x279   : > { %v639_v15 = vpop.permute.xlu1 %638  ;;  %v727_v16 = vpop.permute.xlu0 %726 }
 0x27a   : > { %v646_v63 = vsel %vm270_vm5, %v639_v15, %v643_v55  ;;  %v648_v0 = vsel %vm270_vm5, %v643_v55, %v639_v15  ;;  %v734_v1 = vsel %vm372_vm3, %v727_v16, %v731_v37  ;;  %v736_v2 = vsel %vm372_vm3, %v731_v37, %v727_v16  ;;  %v709_v8 = vpop.permute.xlu2 %708 }
 0x27b   : > { %v650_v7 = vmul.f32 %v648_v0, %v2402_v3  ;;  %v651_v9 = vmul.f32 %v646_v63, %v2405_v4  ;;  %v738_v10 = vmul.f32 %v734_v1, %v2370_v42  ;;  %v739_v11 = vmul.f32 %v736_v2, %v2373_v43 }
 0x27d   : > { %v654_v61 = vpack.c.bf16 %v651_v9, %v650_v7  ;;  %v742_v14 = vpack.c.bf16 %v739_v11, %v738_v10 }
 0x27f   : > { %656 = vst [vmem:[#allocation2 + $0x20] sm:$0xff] %v654_v61 }
 0x280   : > { %744 = vst [vmem:[#allocation2 + $0x70] sm:$0xff] %v742_v14 }
 0x281   : > { %v713_v23 = vpop.permute.xlu1 %712  ;;  %v659_v24 = vpop.permute.xlu0 %658 }
 0x282   : > { %v715_v25 = vsel %vm349_vm2, %v709_v8, %v713_v23  ;;  %v717_v29 = vsel %vm349_vm2, %v713_v23, %v709_v8  ;;  %v666_v32 = vsel %vm293_vm6, %v659_v24, %v663_v45  ;;  %v668_v33 = vsel %vm293_vm6, %v663_v45, %v659_v24  ;;  %v2625_v34 = vpop.permute.xlu2 %624 }
 0x283   : > { %v720_v35 = vmul.f32 %v715_v25, %v2363_v40  ;;  %v721_v37 = vmul.f32 %v717_v29, %v2366_v41  ;;  %v670_v47 = vmul.f32 %v668_v33, %v2409_v5  ;;  %v671_v48 = vmul.f32 %v666_v32, %v2412_v6 }
 0x285   : > { %v723_v49 = vpack.c.bf16 %v721_v37, %v720_v35  ;;  %v674_v50 = vpack.c.bf16 %v671_v48, %v670_v47  ;;  %v1933_v48 = vld [vmem:[#allocation2 + $0x60] sm:$0xf] }
 0x287   : > { %725 = vst [vmem:[#allocation2 + $0x68] sm:$0xff] %v723_v49  ;;  %v1941_v25 = vld [vmem:[#allocation2 + $0x70] sm:$0xf]  ;;  %v2142_v29 = vld [vmem:[#allocation2 + $0x74] sm:$0xf] }
 0x288   : > { %676 = vst [vmem:[#allocation2 + $0x30] sm:$0xff] %v674_v50  ;;  %v2140_v49 = vld [vmem:[#allocation2 + $0x64] sm:$0xf] }
 0x289   : > { %v645_v51 = vpop.permute.xlu1 %644  ;;  %v733_v52 = vpop.permute.xlu0 %732 }
 0x28a   : > { %v641_v53 = vpop.permute.xlu2 %640 }
 0x28b   : > { %v647_v45 = vsel %vm270_vm5, %v641_v53, %v645_v51  ;;  %v649_v13 = vsel %vm270_vm5, %v645_v51, %v641_v53 }
 0x28c   : > { %v652_v54 = vmul.f32 %v649_v13, %v2402_v3  ;;  %v653_v55 = vmul.f32 %v647_v45, %v2405_v4 }
 0x28e   : > { %v655_v56 = vpack.c.bf16 %v653_v55, %v652_v54  ;;  %v2141_v32 = vld [vmem:[#allocation2 + $0x64] sm:$0xf0]  ;;  %v1935_v35 = vld [vmem:[#allocation2 + $0x68] sm:$0xf0] }
 0x28f   : > { %v1938_v53 = vor.u32 %v2140_v49, %v1935_v35  ;;  %v1909_v35 = vld [vmem:[#allocation2 + $0x30] sm:$0xf] }
 0x290   : > { %657 = vst [vmem:[#allocation2 + $0x28] sm:$0xff] %v655_v56 }
 0x291   : > { %v729_v59 = vpop.permute.xlu1 %728  ;;  %v665_v60 = vpop.permute.xlu0 %664 }
 0x292   : > { %v735_v62 = vsel %vm372_vm3, %v729_v59, %v733_v52  ;;  %v737_v28 = vsel %vm372_vm3, %v733_v52, %v729_v59  ;;  %v1934_v52 = vor.u32 %v2141_v32, %v1933_v48 }
 0x293   : > { %v740_v15 = vmul.f32 %v735_v62, %v2370_v42  ;;  %v741_v16 = vmul.f32 %v737_v28, %v2373_v43 }
 0x295   : > { %v743_v63 = vpack.c.bf16 %v741_v16, %v740_v15 }
 0x297   : > { %745 = vst [vmem:[#allocation2 + $0x78] sm:$0xff] %v743_v63  ;;  %v1925_v63 = vld [vmem:[#allocation2 + $0x50] sm:$0xf] }
 0x299   : > { %v623_v0 = vpop.permute.xlu1 %622  ;;  %v689_v1 = vpop.permute.xlu0 %688 }
 0x29a   : > { %v626_v2 = vsel %vm247_vm7, %v2595_v46, %v623_v0  ;;  %v628_v8 = vsel %vm247_vm7, %v623_v0, %v2595_v46  ;;  %v695_v7 = vsel %vm326_vm4, %v689_v1, %v693_v12  ;;  %v697_v9 = vsel %vm326_vm4, %v693_v12, %v689_v1  ;;  %v603_v12 = vpop.permute.xlu2 %602 }
 0x29b   : > { %v630_v10 = vmul.f32 %v628_v8, %v2428_v26  ;;  %v631_v11 = vmul.f32 %v626_v2, %v2431_v27  ;;  %v700_v61 = vmul.f32 %v695_v7, %v2389_v57  ;;  %v701_v14 = vmul.f32 %v697_v9, %v2392_v58 }
 0x29d   : > { %v634_v23 = vpack.c.bf16 %v631_v11, %v630_v10  ;;  %v703_v24 = vpack.c.bf16 %v701_v14, %v700_v61  ;;  %v2137_v10 = vld [vmem:[#allocation2 + $0x44] sm:$0xf0]  ;;  %v1919_v11 = vld [vmem:[#allocation2 + $0x48] sm:$0xf0] }
 0x29e   : > { %v2143_v46 = vld [vmem:[#allocation2 + $0x74] sm:$0xf0]  ;;  %v1943_v33 = vld [vmem:[#allocation2 + $0x78] sm:$0xf0] }
 0x29f   : > { %636 = vst [vmem:[#allocation2 + $0x10] sm:$0xff] %v634_v23  ;;  %v1942_v37 = vor.u32 %v2143_v46, %v1941_v25  ;;  %v1946_v47 = vor.u32 %v2142_v29, %v1943_v33  ;;  %v1917_v25 = vld [vmem:[#allocation2 + $0x40] sm:$0xf]  ;;  %v2136_v29 = vld [vmem:[#allocation2 + $0x44] sm:$0xf] }
 0x2a0   : > { %705 = vst [vmem:[#allocation2 + $0x58] sm:$0xff] %v703_v24  ;;  %v1918_v32 = vor.u32 %v2137_v10, %v1917_v25  ;;  %v1922_v46 = vor.u32 %v2136_v29, %v1919_v11 }
 0x2a1   : > { %v661_v50 = vpop.permute.xlu1 %660  ;;  %v599_v51 = vpop.permute.xlu0 %598  ;;  %893 = vmatpush.bf16.msrb.mxu3 %v1942_v37  ;;  %921 = vmatpush.bf16.msrb.mxu2 %v1946_v47  ;;  %v2134_v47 = vld [vmem:[#allocation2 + $0x34] sm:$0xf] }
 0x2a2   : > { %v667_v45 = vsel %vm293_vm6, %v661_v50, %v665_v60  ;;  %v669_v13 = vsel %vm293_vm6, %v665_v60, %v661_v50  ;;  %v606_v54 = vsel %vm224_vm8, %v599_v51, %v603_v12  ;;  %v608_v55 = vsel %vm224_vm8, %v603_v12, %v599_v51  ;;  %v2138_v60 = vld [vmem:[#allocation2 + $0x54] sm:$0xf]  ;;  %v2133_v51 = vld [vmem:[#allocation2 + $0x24] sm:$0xf0] }
 0x2a3   : > { %v672_v56 = vmul.f32 %v669_v13, %v2409_v5  ;;  %v673_v59 = vmul.f32 %v667_v45, %v2412_v6  ;;  %v610_v62 = vmul.f32 %v608_v55, %v2443_v38  ;;  %v611_v28 = vmul.f32 %v606_v54, %v2446_v44  ;;  %v1901_v55 = vld [vmem:[#allocation2 + $0x20] sm:$0xf] }
 0x2a5   : > { %v675_v15 = vpack.c.bf16 %v673_v59, %v672_v56  ;;  %v614_v16 = vpack.c.bf16 %v611_v28, %v610_v62  ;;  %894 = vmatpush.bf16.msrb.mxu3 %v1934_v52  ;;  %922 = vmatpush.bf16.msrb.mxu2 %v1938_v53  ;;  %v1903_v52 = vld [vmem:[#allocation2 + $0x28] sm:$0xf0]  ;;  %v2132_v56 = vld [vmem:[#allocation2 + $0x24] sm:$0xf]  ;;  %v1902_v59 = vor.u32 %v2133_v51, %v1901_v55 }
 0x2a6   : > { %v1906_v62 = vor.u32 %v2132_v56, %v1903_v52 }
 0x2a7   : > { %677 = vst [vmem:[#allocation2 + $0x38] sm:$0xff] %v675_v15  ;;  %v2139_v0 = vld [vmem:[#allocation2 + $0x54] sm:$0xf0]  ;;  %v1927_v1 = vld [vmem:[#allocation2 + $0x58] sm:$0xf0] }
 0x2a8   : > { %616 = vst [vmem:[#allocation2] sm:$0xff] %v614_v16  ;;  %v1926_v2 = vor.u32 %v2139_v0, %v1925_v63  ;;  %v1930_v8 = vor.u32 %v2138_v60, %v1927_v1  ;;  %v1893_v15 = vld [vmem:[#allocation2 + $0x10] sm:$0xf]  ;;  %v2130_v63 = vld [vmem:[#allocation2 + $0x14] sm:$0xf] }
 0x2a9   : > { %v747_v7 = vpop.permute.xlu1 %746  ;;  %v621_v9 = vpop.permute.xlu0 %620 }
 0x2aa   : > { %v627_v61 = vsel %vm247_vm7, %v621_v9, %v2625_v34  ;;  %v629_v14 = vsel %vm247_vm7, %v2625_v34, %v621_v9  ;;  %895 = vmatpush.bf16.msrb.mxu3 %v1926_v2  ;;  %923 = vmatpush.bf16.msrb.mxu2 %v1930_v8  ;;  %v749_v2 = vpop.permute.xlu2 %748 }
 0x2ab   : > { %v632_v23 = vmul.f32 %v629_v14, %v2428_v26  ;;  %v633_v24 = vmul.f32 %v627_v61, %v2431_v27 }
 0x2ad   : > { %v635_v33 = vpack.c.bf16 %v633_v24, %v632_v23 }
 0x2ae   : > { %896 = vmatpush.bf16.msrb.mxu3 %v1918_v32  ;;  %924 = vmatpush.bf16.msrb.mxu2 %v1922_v46  ;;  %v2135_v37 = vld [vmem:[#allocation2 + $0x34] sm:$0xf0]  ;;  %v1911_v12 = vld [vmem:[#allocation2 + $0x38] sm:$0xf0] }
 0x2af   : > { %637 = vst [vmem:[#allocation2 + $0x18] sm:$0xff] %v635_v33  ;;  %v1910_v48 = vor.u32 %v2135_v37, %v1909_v35  ;;  %v1914_v34 = vor.u32 %v2134_v47, %v1911_v12  ;;  %v1885_v33 = vld [vmem:[#allocation2] sm:$0xf]  ;;  %v766_v35 = vld [vmem:[%s3113_s1 + $0x40] sm:$0xff]  ;;  %v2128_v47 = vld [vmem:[#allocation2 + $0x4] sm:$0xf] }
 0x2b1   : > { %v601_v49 = vpop.permute.xlu1 %600  ;;  %v605_v50 = vpop.permute.xlu0 %604 }
 0x2b2   : > { %v607_v53 = vsel %vm224_vm8, %v601_v49, %v605_v50  ;;  %v609_v45 = vsel %vm224_vm8, %v605_v50, %v601_v49  ;;  %897 = vmatpush.bf16.msrb.mxu3 %v1910_v48  ;;  %925 = vmatpush.bf16.msrb.mxu2 %v1914_v34 }
 0x2b3   : > { %v612_v13 = vmul.f32 %v609_v45, %v2443_v38  ;;  %v613_v54 = vmul.f32 %v607_v53, %v2446_v44  ;;  %v793_v45 = vpop.permute.xlu2 %792 }
 0x2b5   : > { %v615_v28 = vpack.c.bf16 %v613_v54, %v612_v13 }
 0x2b6   : > { %898 = vmatpush.bf16.msrb.mxu3 %v1902_v59  ;;  %926 = vmatpush.bf16.msrb.mxu2 %v1906_v62  ;;  %v2131_v16 = vld [vmem:[#allocation2 + $0x14] sm:$0xf0]  ;;  %v1895_v60 = vld [vmem:[#allocation2 + $0x18] sm:$0xf0] }
 0x2b7   : > { %617 = vst [vmem:[#allocation2 + $0x8] sm:$0xff] %v615_v28  ;;  %v1894_v0 = vor.u32 %v2131_v16, %v1893_v15  ;;  %v1898_v1 = vor.u32 %v2130_v63, %v1895_v60 }
 0x2b9   : > { %v753_v8 = vpop.permute.xlu1 %752  ;;  %v751_v9 = vpop.permute.xlu0 %750 }
 0x2ba   : > { %v755_v10 = vsel %vm395_vm9, %v749_v2, %v753_v8  ;;  %v757_v11 = vsel %vm395_vm9, %v753_v8, %v749_v2  ;;  %v754_v61 = vsel %vm395_vm9, %v747_v7, %v751_v9  ;;  %v756_v14 = vsel %vm395_vm9, %v751_v9, %v747_v7  ;;  %899 = vmatpush.bf16.msrb.mxu3 %v1894_v0  ;;  %v768_v7 = vld [vmem:[%s3113_s1 + $0x50] sm:$0xff] }
 0x2bb   : > { %v760_v23 = vmul.f32 %v2477_v17, %v755_v10  ;;  %v761_v24 = vmul.f32 %v2482_v22, %v757_v11  ;;  %v758_v25 = vmul.f32 %v2477_v17, %v754_v61  ;;  %v759_v29 = vmul.f32 %v2482_v22, %v756_v14  ;;  %927 = vmatpush.bf16.msrb.mxu2 %v1898_v1 }
 0x2bc   : > { %v770_v22 = vpack.c.bf16 %v768_v7, %v766_v35  ;;  %v1126_v35 = vld [vmem:[%s3113_s1 + $0x68] sm:$0xff] }
 0x2bd   : > { %v763_v32 = vpack.c.bf16 %v761_v24, %v760_v23  ;;  %v762_v46 = vpack.c.bf16 %v759_v29, %v758_v25 }
 0x2be   : > { %v2129_v37 = vld [vmem:[#allocation2 + $0x4] sm:$0xf0]  ;;  %v1887_v12 = vld [vmem:[#allocation2 + $0x8] sm:$0xf0] }
 0x2bf   : > { %765 = vst [vmem:[#allocation2 + $0x88] sm:$0xff] %v763_v32  ;;  %v1886_v48 = vor.u32 %v2129_v37, %v1885_v33  ;;  %v1890_v17 = vor.u32 %v2128_v47, %v1887_v12 }
 0x2c0   : > { %764 = vst [vmem:[#allocation2 + $0x80] sm:$0xff] %v762_v46 }
 0x2c1   : > { %900 = vmatpush.bf16.msrb.mxu3 %v1886_v48  ;;  %928 = vmatpush.bf16.msrb.mxu2 %v1890_v17  ;;  %v798_v60 = vpop.permute.xlu0 %797 }
 0x2c4   : > { %901 = vmatmul.bf16.vlgmr.msrb.gmra.mxu3 %v770_v22  ;;  %929 = vmatmul.bf16.vlgmr.msrb.gmra.mxu2 %v770_v22 }
 0x2c6   : > { %v2145_v34 = vld [vmem:[#allocation2 + $0x84] sm:$0xf0]  ;;  %v1951_v49 = vld [vmem:[#allocation2 + $0x88] sm:$0xf0] }
 0x2c7   : > { %v1949_v50 = vld [vmem:[#allocation2 + $0x80] sm:$0xf]  ;;  %v2144_v51 = vld [vmem:[#allocation2 + $0x84] sm:$0xf] }
 0x2c8   : > { %v1950_v52 = vor.u32 %v2145_v34, %v1949_v50  ;;  %v1954_v53 = vor.u32 %v2144_v51, %v1951_v49 }
 0x2ca   : > { %914 = vmatpush.bf16.msra.mxu1 %v1950_v52  ;;  %942 = vmatpush.bf16.msra.mxu0 %v1954_v53 }
 0x2cd   : > { %1955 = vmatmul.msk.bf16.vlgmr.msra.gmra.mxu1 %vm534_vm10, %v2578_v36  ;;  %1956 = vmatmul.msk.bf16.vlgmr.msra.gmra.mxu0 %vm534_vm10, %v2578_v36 }
 0x347   : > { %v902_v13 = vpop.f32.mrf.mxu3  ;;  %v930_v54 = vpop.f32.mrf.mxu2 }
 0x348   : > { %v903_v55 = vadd.f32 %v902_v13, %v793_v45  ;;  %v931_v56 = vadd.f32 %v930_v54, %v793_v45 }
 0x34a   : > { %v916_v59 = vpop.f32.mrf.mxu1  ;;  %v944_v62 = vpop.f32.mrf.mxu0 }
 0x34b   : > { %v917_v28 = vadd.f32 %v916_v59, %v903_v55  ;;  %v945_v15 = vadd.f32 %v944_v62, %v931_v56 }
 0x34d   : > { %v949_v16 = vadd.f32 %v917_v28, %v2279_v20  ;;  %v950_v63 = vadd.f32 %v945_v15, %v2281_v21 }
 0x34f   : > { %v2707_v0 = vmax.f32 %v949_v16, 0.0  ;;  %v2709_v1 = vmax.f32 %v950_v63, 0.0  ;;  %v904_v2 = vpop.f32.mrf.mxu3  ;;  %v932_v36 = vpop.f32.mrf.mxu2 }
 0x350   : > { %v905_v8 = vadd.f32 %v904_v2, %v798_v60  ;;  %v933_v9 = vadd.f32 %v932_v36, %v798_v60 }
 0x351   : > { %1065 = vrot.lane.b32.xlu0 %v2707_v0, %s2220_s25  ;;  %1085 = vrot.lane.b32.xlu1 %v2707_v0, %s2219_s24  ;;  %v1037_v20 = vmul.f32 %v2707_v0, %v2274_v18  ;;  %v1038_v21 = vmul.f32 %v2709_v1, %v2277_v19 }
 0x352   : > { %1069 = vrot.lane.b32.xlu2 %v2709_v1, %s2220_s25  ;;  %v918_v10 = vpop.f32.mrf.mxu1  ;;  %v946_v11 = vpop.f32.mrf.mxu0 }
 0x353   : > { %v919_v61 = vadd.f32 %v918_v10, %v905_v8  ;;  %v947_v14 = vadd.f32 %v946_v11, %v933_v9  ;;  %v1041_v23 = vpack.c.bf16 %v1038_v21, %v1037_v20 }
 0x355   : > { %v951_v24 = vadd.f32 %v919_v61, %v2293_v30  ;;  %v952_v25 = vadd.f32 %v947_v14, %v2295_v31  ;;  %1043 = vst [vmem:[#allocation2 + $0x40] sm:$0xff] %v1041_v23  ;;  %v1128_v31 = vld [vmem:[%s3113_s1 + $0x78] sm:$0xff] }
 0x356   : > { %v2779_v7 = vpack.c.bf16 %v1128_v31, %v1126_v35 }
 0x357   : > { %v2723_v29 = vmax.f32 %v951_v24, 0.0  ;;  %v2725_v32 = vmax.f32 %v952_v25, 0.0 }
 0x359   : > { %1049 = vrot.lane.b32.xlu0 %v2709_v1, %s2221_s26  ;;  %1089 = vrot.lane.b32.xlu1 %v2709_v1, %s2219_s24  ;;  %v1039_v46 = vmul.f32 %v2723_v29, %v2274_v18  ;;  %v1040_v33 = vmul.f32 %v2725_v32, %v2277_v19 }
 0x35a   : > { %1105 = vrot.lane.b32.xlu2 %v2707_v0, %s2226_s3 }
 0x35b   : > { %v1042_v30 = vpack.c.bf16 %v1040_v33, %v1039_v46 }
 0x35d   : > { %1044 = vst [vmem:[#allocation2 + $0x48] sm:$0xff] %v1042_v30 }
 0x361   : > { %1017 = vrot.lane.b32.xlu0 %v2707_v0, %s2222_s27  ;;  %1045 = vrot.lane.b32.xlu1 %v2707_v0, %s2221_s26 }
 0x362   : > { %1021 = vrot.lane.b32.xlu2 %v2709_v1, %s2222_s27 }
 0x369   : > { %1001 = vrot.lane.b32.xlu0 %v2709_v1, %s2223_s28  ;;  %1109 = vrot.lane.b32.xlu1 %v2709_v1, %s2226_s3 }
 0x36a   : > { %977 = vrot.lane.b32.xlu2 %v2707_v0, %s2224_s29 }
 0x371   : > { %957 = vrot.lane.b32.xlu0 %v2707_v0, %s2225_s30  ;;  %997 = vrot.lane.b32.xlu1 %v2707_v0, %s2223_s28 }
 0x372   : > { %1087 = vrot.lane.b32.xlu2 %v2723_v29, %s2219_s24 }
 0x379   : > { %1071 = vrot.lane.b32.xlu0 %v2725_v32, %s2220_s25  ;;  %981 = vrot.lane.b32.xlu1 %v2709_v1, %s2224_s29 }
 0x37a   : > { %1091 = vrot.lane.b32.xlu2 %v2725_v32, %s2219_s24 }
 0x381   : > { %1107 = vrot.lane.b32.xlu0 %v2723_v29, %s2226_s3  ;;  %1067 = vrot.lane.b32.xlu1 %v2723_v29, %s2220_s25 }
 0x382   : > { %1047 = vrot.lane.b32.xlu2 %v2723_v29, %s2221_s26 }
 0x389   : > { %1023 = vrot.lane.b32.xlu0 %v2725_v32, %s2222_s27  ;;  %1051 = vrot.lane.b32.xlu1 %v2725_v32, %s2221_s26 }
 0x38a   : > { %1111 = vrot.lane.b32.xlu2 %v2725_v32, %s2226_s3 }
 0x391   : > { %979 = vrot.lane.b32.xlu0 %v2723_v29, %s2224_s29  ;;  %1019 = vrot.lane.b32.xlu1 %v2723_v29, %s2222_s27 }
 0x392   : > { %999 = vrot.lane.b32.xlu2 %v2723_v29, %s2223_s28 }
 0x399   : > { %963 = vrot.lane.b32.xlu0 %v2725_v32, %s2225_s30  ;;  %1003 = vrot.lane.b32.xlu1 %v2725_v32, %s2223_s28 }
 0x39a   : > { %983 = vrot.lane.b32.xlu2 %v2725_v32, %s2224_s29 }
 0x3a1   : > { %959 = vrot.lane.b32.xlu1 %v2723_v29, %s2225_s30 }
 0x3a2   : > { %961 = vrot.lane.b32.xlu2 %v2709_v1, %s2225_s30 }
 0x3a9   : > { %1151 = vperm.xlu1 %2201, %v1126_v35  }
 0x3aa   : > { %1156 = vperm.xlu2 %2202, %v1128_v31  }
 0x3ac   : > { %v1070_v37 = vpop.permute.xlu2 %1069 }
 0x3b4   : > { %v1106_v47 = vpop.permute.xlu2 %1105 }
 0x3bc   : > { %v1022_v12 = vpop.permute.xlu2 %1021 }
 0x3c3   : > { %v1066_v48 = vpop.permute.xlu0 %1065  ;;  %v1086_v17 = vpop.permute.xlu1 %1085 }
 0x3c4   : > { %v1073_v22 = vsel %vm349_vm2, %v1066_v48, %v1070_v37  ;;  %v1075_v34 = vsel %vm349_vm2, %v1070_v37, %v1066_v48  ;;  %v2801_v49 = vpop.permute.xlu2 %977  ;;  %v2836_v37 = vld [vmem:[%s3113_s1 + $0xe0] ss:$0 sm:$0xff]  ;;  %v2842_v48 = vld [vmem:[%s3113_s1 + $0xe8] ss:$0 sm:$0xff] }
 0x3c5   : > { %v1077_v50 = vmul.f32 %v1073_v22, %v2363_v40  ;;  %v1078_v51 = vmul.f32 %v1075_v34, %v2366_v41 }
 0x3c7   : > { %v1081_v52 = vpack.c.bf16 %v1078_v51, %v1077_v50 }
 0x3c9   : > { %1083 = vst [vmem:[#allocation2 + $0x60] sm:$0xff] %v1081_v52 }
 0x3cb   : > { %v1050_v53 = vpop.permute.xlu0 %1049  ;;  %v1090_v45 = vpop.permute.xlu1 %1089 }
 0x3cc   : > { %v1088_v13 = vpop.permute.xlu2 %1087  ;;  %v1093_v54 = vsel %vm372_vm3, %v1086_v17, %v1090_v45  ;;  %v1095_v55 = vsel %vm372_vm3, %v1090_v45, %v1086_v17 }
 0x3cd   : > { %v1097_v56 = vmul.f32 %v1093_v54, %v2370_v42  ;;  %v1098_v59 = vmul.f32 %v1095_v55, %v2373_v43 }
 0x3cf   : > { %v1101_v62 = vpack.c.bf16 %v1098_v59, %v1097_v56 }
 0x3d1   : > { %1103 = vst [vmem:[#allocation2 + $0x70] sm:$0xff] %v1101_v62 }
 0x3d3   : > { %v1018_v28 = vpop.permute.xlu0 %1017  ;;  %v1046_v15 = vpop.permute.xlu1 %1045 }
 0x3d4   : > { %v1025_v16 = vsel %vm293_vm6, %v1018_v28, %v1022_v12  ;;  %v1027_v63 = vsel %vm293_vm6, %v1022_v12, %v1018_v28  ;;  %v1092_v60 = vpop.permute.xlu2 %1091  ;;  %v1053_v2 = vsel %vm326_vm4, %v1046_v15, %v1050_v53  ;;  %v1055_v36 = vsel %vm326_vm4, %v1050_v53, %v1046_v15 }
 0x3d5   : > { %v1029_v8 = vmul.f32 %v1027_v63, %v2409_v5  ;;  %v1030_v9 = vmul.f32 %v1025_v16, %v2412_v6  ;;  %v1094_v20 = vsel %vm372_vm3, %v1088_v13, %v1092_v60  ;;  %v1096_v21 = vsel %vm372_vm3, %v1092_v60, %v1088_v13 }
 0x3d6   : > { %v1099_v10 = vmul.f32 %v1094_v20, %v2370_v42  ;;  %v1100_v11 = vmul.f32 %v1096_v21, %v2373_v43  ;;  %v1057_v61 = vmul.f32 %v1053_v2, %v2389_v57  ;;  %v1058_v14 = vmul.f32 %v1055_v36, %v2392_v58 }
 0x3d7   : > { %v1033_v23 = vpack.c.bf16 %v1030_v9, %v1029_v8 }
 0x3d8   : > { %v1102_v24 = vpack.c.bf16 %v1100_v11, %v1099_v10  ;;  %v1061_v25 = vpack.c.bf16 %v1058_v14, %v1057_v61  ;;  %v2015_v34 = vld [vmem:[#allocation2 + $0x70] sm:$0xf]  ;;  %v2160_v50 = vld [vmem:[#allocation2 + $0x74] sm:$0xf] }
 0x3d9   : > { %1035 = vst [vmem:[#allocation2 + $0x30] sm:$0xff] %v1033_v23 }
 0x3da   : > { %1104 = vst [vmem:[#allocation2 + $0x78] sm:$0xff] %v1102_v24 }
 0x3db   : > { %1063 = vst [vmem:[#allocation2 + $0x50] sm:$0xff] %v1061_v25  ;;  %v1002_v46 = vpop.permute.xlu0 %1001  ;;  %v1110_v33 = vpop.permute.xlu1 %1109 }
 0x3dc   : > { %v1048_v30 = vpop.permute.xlu2 %1047  ;;  %v1113_v31 = vsel %vm395_vm9, %v1106_v47, %v1110_v33  ;;  %v1115_v35 = vsel %vm395_vm9, %v1110_v33, %v1106_v47 }
 0x3dd   : > { %v1117_v12 = vmul.f32 %v2836_v37, %v1113_v31  ;;  %v1118_v17 = vmul.f32 %v2842_v48, %v1115_v35 }
 0x3df   : > { %v1121_v22 = vpack.c.bf16 %v1118_v17, %v1117_v12 }
 0x3e1   : > { %1123 = vst [vmem:[#allocation2 + $0x80] sm:$0xff] %v1121_v22  ;;  %v2161_v51 = vld [vmem:[#allocation2 + $0x74] sm:$0xf0]  ;;  %v2017_v47 = vld [vmem:[#allocation2 + $0x78] sm:$0xf0] }
 0x3e2   : > { %v2016_v52 = vor.u32 %v2161_v51, %v2015_v34  ;;  %v2020_v53 = vor.u32 %v2160_v50, %v2017_v47 }
 0x3e3   : > { %v958_v45 = vpop.permute.xlu0 %957  ;;  %v998_v13 = vpop.permute.xlu1 %997 }
 0x3e4   : > { %v1112_v54 = vpop.permute.xlu2 %1111  ;;  %1252 = vmatpush.bf16.msrb.mxu1 %v2016_v52  ;;  %1280 = vmatpush.bf16.msrb.mxu0 %v2020_v53  ;;  %v1005_v55 = vsel %vm270_vm5, %v998_v13, %v1002_v46  ;;  %v1007_v56 = vsel %vm270_vm5, %v1002_v46, %v998_v13 }
 0x3e5   : > { %v1009_v59 = vmul.f32 %v1007_v56, %v2402_v3  ;;  %v1010_v62 = vmul.f32 %v1005_v55, %v2405_v4  ;;  %v2007_v55 = vld [vmem:[#allocation2 + $0x60] sm:$0xf] }
 0x3e7   : > { %v1013_v28 = vpack.c.bf16 %v1010_v62, %v1009_v59  ;;  %v2158_v59 = vld [vmem:[#allocation2 + $0x64] sm:$0xf] }
 0x3e8   : > { %v2023_v56 = vld [vmem:[#allocation2 + $0x80] sm:$0xf] }
 0x3e9   : > { %1015 = vst [vmem:[#allocation2 + $0x20] sm:$0xff] %v1013_v28  ;;  %v2162_v28 = vld [vmem:[#allocation2 + $0x84] sm:$0xf] }
 0x3eb   : > { %v1072_v15 = vpop.permute.xlu0 %1071  ;;  %v982_v16 = vpop.permute.xlu1 %981 }
 0x3ec   : > { %v2851_v63 = vpop.permute.xlu2 %999  ;;  %v985_v60 = vsel %vm247_vm7, %v2801_v49, %v982_v16  ;;  %v987_v2 = vsel %vm247_vm7, %v982_v16, %v2801_v49 }
 0x3ed   : > { %v989_v36 = vmul.f32 %v987_v2, %v2428_v26  ;;  %v990_v8 = vmul.f32 %v985_v60, %v2431_v27 }
 0x3ef   : > { %v993_v9 = vpack.c.bf16 %v990_v8, %v989_v36 }
 0x3f1   : > { %995 = vst [vmem:[#allocation2 + $0x10] sm:$0xff] %v993_v9 }
 0x3f3   : > { %v1108_v20 = vpop.permute.xlu0 %1107  ;;  %v1068_v21 = vpop.permute.xlu1 %1067 }
 0x3f4   : > { %v1114_v10 = vsel %vm395_vm9, %v1108_v20, %v1112_v54  ;;  %v1116_v11 = vsel %vm395_vm9, %v1112_v54, %v1108_v20  ;;  %v984_v61 = vpop.permute.xlu2 %983  ;;  %v1074_v14 = vsel %vm349_vm2, %v1068_v21, %v1072_v15  ;;  %v1076_v49 = vsel %vm349_vm2, %v1072_v15, %v1068_v21 }
 0x3f5   : > { %v1119_v23 = vmul.f32 %v2836_v37, %v1114_v10  ;;  %v1120_v24 = vmul.f32 %v2842_v48, %v1116_v11  ;;  %v1079_v25 = vmul.f32 %v1074_v14, %v2363_v40  ;;  %v1080_v46 = vmul.f32 %v1076_v49, %v2366_v41 }
 0x3f7   : > { %v1122_v33 = vpack.c.bf16 %v1120_v24, %v1119_v23  ;;  %v1082_v31 = vpack.c.bf16 %v1080_v46, %v1079_v25  ;;  %v1999_v46 = vld [vmem:[#allocation2 + $0x50] sm:$0xf] }
 0x3f9   : > { %1124 = vst [vmem:[#allocation2 + $0x88] sm:$0xff] %v1122_v33 }
 0x3fa   : > { %1084 = vst [vmem:[#allocation2 + $0x68] sm:$0xff] %v1082_v31 }
 0x3fb   : > { %v1024_v35 = vpop.permute.xlu0 %1023  ;;  %v1052_v12 = vpop.permute.xlu1 %1051 }
 0x3fc   : > { %v962_v17 = vpop.permute.xlu2 %961  ;;  %v1054_v22 = vsel %vm326_vm4, %v1048_v30, %v1052_v12  ;;  %v1056_v34 = vsel %vm326_vm4, %v1052_v12, %v1048_v30  ;;  %v2156_v12 = vld [vmem:[#allocation2 + $0x54] sm:$0xf] }
 0x3fd   : > { %v965_v50 = vsel %vm224_vm8, %v958_v45, %v962_v17  ;;  %v967_v51 = vsel %vm224_vm8, %v962_v17, %v958_v45  ;;  %v1059_v47 = vmul.f32 %v1054_v22, %v2389_v57  ;;  %v1060_v52 = vmul.f32 %v1056_v34, %v2392_v58 }
 0x3fe   : > { %v969_v53 = vmul.f32 %v967_v51, %v2443_v38  ;;  %v970_v13 = vmul.f32 %v965_v50, %v2446_v44  ;;  %v2155_v50 = vld [vmem:[#allocation2 + $0x44] sm:$0xf0] }
 0x3ff   : > { %v1062_v54 = vpack.c.bf16 %v1060_v52, %v1059_v47 }
 0x400   : > { %v973_v62 = vpack.c.bf16 %v970_v13, %v969_v53  ;;  %v2163_v30 = vld [vmem:[#allocation2 + $0x84] sm:$0xf0]  ;;  %v2025_v15 = vld [vmem:[#allocation2 + $0x88] sm:$0xf0]  ;;  %v1991_v53 = vld [vmem:[#allocation2 + $0x40] sm:$0xf] }
 0x401   : > { %1064 = vst [vmem:[#allocation2 + $0x58] sm:$0xff] %v1062_v54  ;;  %v2159_v16 = vld [vmem:[#allocation2 + $0x64] sm:$0xf0]  ;;  %v2024_v60 = vor.u32 %v2163_v30, %v2023_v56  ;;  %v2009_v45 = vld [vmem:[#allocation2 + $0x68] sm:$0xf0]  ;;  %v2028_v2 = vor.u32 %v2162_v28, %v2025_v15  ;;  %v1992_v56 = vor.u32 %v2155_v50, %v1991_v53 }
 0x402   : > { %975 = vst [vmem:[#allocation2] sm:$0xff] %v973_v62  ;;  %v2008_v36 = vor.u32 %v2159_v16, %v2007_v55  ;;  %v2012_v8 = vor.u32 %v2158_v59, %v2009_v45  ;;  %v2154_v13 = vld [vmem:[#allocation2 + $0x44] sm:$0xf]  ;;  %v1983_v30 = vld [vmem:[#allocation2 + $0x30] sm:$0xf] }
 0x403   : > { %v980_v9 = vpop.permute.xlu0 %979  ;;  %1273 = vmatpush.bf16.msra.mxu3 %v2024_v60  ;;  %v1020_v20 = vpop.permute.xlu1 %1019  ;;  %v2152_v28 = vld [vmem:[#allocation2 + $0x34] sm:$0xf] }
 0x404   : > { %v986_v21 = vsel %vm247_vm7, %v980_v9, %v984_v61  ;;  %v988_v10 = vsel %vm247_vm7, %v984_v61, %v980_v9  ;;  %1253 = vmatpush.bf16.msrb.mxu1 %v2008_v36  ;;  %1281 = vmatpush.bf16.msrb.mxu0 %v2012_v8  ;;  %v1026_v11 = vsel %vm293_vm6, %v1020_v20, %v1024_v35 }
 0x405   : > { %v991_v14 = vmul.f32 %v988_v10, %v2428_v26  ;;  %v992_v49 = vmul.f32 %v986_v21, %v2431_v27  ;;  %v1028_v23 = vsel %vm293_vm6, %v1024_v35, %v1020_v20  ;;  %v1032_v24 = vmul.f32 %v1026_v11, %v2412_v6  ;;  %v1993_v35 = vld [vmem:[#allocation2 + $0x48] sm:$0xf0]  ;;  %v1975_v10 = vld [vmem:[#allocation2 + $0x20] sm:$0xf] }
 0x406   : > { %v1031_v25 = vmul.f32 %v1028_v23, %v2409_v5  ;;  %2029 = vmatmul.msk.bf16.vlgmr.msra.gmra.mxu3 %vm534_vm10, %v2779_v7  ;;  %v1996_v59 = vor.u32 %v2154_v13, %v1993_v35 }
 0x407   : > { %1301 = vmatpush.bf16.msrb.mxu3 %v2028_v2  ;;  %v994_v61 = vpack.c.bf16 %v992_v49, %v991_v14  ;;  %v2150_v14 = vld [vmem:[#allocation2 + $0x24] sm:$0xf] }
 0x408   : > { %v1034_v33 = vpack.c.bf16 %v1032_v24, %v1031_v25  ;;  %v2157_v31 = vld [vmem:[#allocation2 + $0x54] sm:$0xf0]  ;;  %v2001_v17 = vld [vmem:[#allocation2 + $0x58] sm:$0xf0] }
 0x409   : > { %996 = vst [vmem:[#allocation2 + $0x18] sm:$0xff] %v994_v61  ;;  %v2000_v22 = vor.u32 %v2157_v31, %v1999_v46  ;;  %v2004_v34 = vor.u32 %v2156_v12, %v2001_v17  ;;  %v1967_v46 = vld [vmem:[#allocation2 + $0x10] sm:$0xf]  ;;  %v1959_v17 = vld [vmem:[#allocation2] sm:$0xf] }
 0x40a   : > { %1036 = vst [vmem:[#allocation2 + $0x38] sm:$0xff] %v1034_v33  ;;  %v2148_v33 = vld [vmem:[#allocation2 + $0x14] sm:$0xf]  ;;  %v2146_v50 = vld [vmem:[#allocation2 + $0x4] sm:$0xf] }
 0x40b   : > { %1254 = vmatpush.bf16.msrb.mxu1 %v2000_v22  ;;  %1282 = vmatpush.bf16.msrb.mxu0 %v2004_v34  ;;  %v1004_v51 = vpop.permute.xlu1 %1003  ;;  %v964_v2 = vpop.permute.xlu0 %963  ;;  %v1127_v22 = vld [vmem:[%s3113_s1 + $0x70] sm:$0xff] }
 0x40c   : > { %v1006_v47 = vsel %vm270_vm5, %v2851_v63, %v1004_v51  ;;  %v1008_v52 = vsel %vm270_vm5, %v1004_v51, %v2851_v63 }
 0x40d   : > { %v1011_v54 = vmul.f32 %v1008_v52, %v2402_v3  ;;  %v1012_v55 = vmul.f32 %v1006_v47, %v2405_v4 }
 0x40f   : > { %v1014_v62 = vpack.c.bf16 %v1012_v55, %v1011_v54  ;;  %1255 = vmatpush.bf16.msrb.mxu1 %v1992_v56  ;;  %1283 = vmatpush.bf16.msrb.mxu0 %v1996_v59 }
 0x410   : > { %v2149_v25 = vld [vmem:[#allocation2 + $0x14] sm:$0xf0]  ;;  %v1969_v61 = vld [vmem:[#allocation2 + $0x18] sm:$0xf0] }
 0x411   : > { %1016 = vst [vmem:[#allocation2 + $0x28] sm:$0xff] %v1014_v62  ;;  %v2153_v15 = vld [vmem:[#allocation2 + $0x34] sm:$0xf0]  ;;  %v1985_v16 = vld [vmem:[#allocation2 + $0x38] sm:$0xf0]  ;;  %v1968_v31 = vor.u32 %v2149_v25, %v1967_v46  ;;  %v1972_v12 = vor.u32 %v2148_v33, %v1969_v61 }
 0x412   : > { %v1984_v60 = vor.u32 %v2153_v15, %v1983_v30  ;;  %v1988_v45 = vor.u32 %v2152_v28, %v1985_v16  ;;  %v2968_v33 = vld [vmem:[%s3113_s1 + $0xa0] sm:$0xff] }
 0x413   : > { %v960_v63 = vpop.permute.xlu1 %959 }
 0x414   : > { %v966_v36 = vsel %vm224_vm8, %v960_v63, %v964_v2  ;;  %v968_v8 = vsel %vm224_vm8, %v964_v2, %v960_v63  ;;  %1256 = vmatpush.bf16.msrb.mxu1 %v1984_v60  ;;  %1284 = vmatpush.bf16.msrb.mxu0 %v1988_v45  ;;  %v1157_v45 = vpop.permute.xlu2 %1156 }
 0x415   : > { %v971_v9 = vmul.f32 %v968_v8, %v2443_v38  ;;  %v972_v20 = vmul.f32 %v966_v36, %v2446_v44 }
 0x416   : > { %2030 = vmatmul.msk.bf16.vlgmr.msrb.gmra.mxu3 %vm534_vm10, %v2779_v7  ;;  %v1125_v7 = vld [vmem:[%s3113_s1 + $0x60] sm:$0xff] }
 0x417   : > { %v974_v21 = vpack.c.bf16 %v972_v20, %v971_v9  ;;  %v1129_v52 = vpack.c.bf16 %v1127_v22, %v1125_v7 }
 0x418   : > { %v2151_v11 = vld [vmem:[#allocation2 + $0x24] sm:$0xf0]  ;;  %v1977_v49 = vld [vmem:[#allocation2 + $0x28] sm:$0xf0] }
 0x419   : > { %976 = vst [vmem:[#allocation2 + $0x8] sm:$0xff] %v974_v21  ;;  %v1976_v23 = vor.u32 %v2151_v11, %v1975_v10  ;;  %v1980_v24 = vor.u32 %v2150_v14, %v1977_v49 }
 0x41b   : > { %1257 = vmatpush.bf16.msrb.mxu1 %v1976_v23  ;;  %1285 = vmatpush.bf16.msrb.mxu0 %v1980_v24  ;;  %v1152_v55 = vpop.permute.xlu1 %1151 }
 0x41f   : > { %1258 = vmatpush.bf16.msrb.mxu1 %v1968_v31  ;;  %1286 = vmatpush.bf16.msrb.mxu0 %v1972_v12 }
 0x420   : > { %v2147_v34 = vld [vmem:[#allocation2 + $0x4] sm:$0xf0]  ;;  %v1961_v35 = vld [vmem:[#allocation2 + $0x8] sm:$0xf0] }
 0x421   : > { %v1960_v51 = vor.u32 %v2147_v34, %v1959_v17  ;;  %v1964_v47 = vor.u32 %v2146_v50, %v1961_v35 }
 0x423   : > { %1259 = vmatpush.bf16.msrb.mxu1 %v1960_v51  ;;  %1287 = vmatpush.bf16.msrb.mxu0 %v1964_v47 }
 0x426   : > { %1260 = vmatmul.bf16.vlgmr.msrb.gmra.mxu1 %v1129_v52  ;;  %1288 = vmatmul.bf16.vlgmr.msrb.gmra.mxu0 %v1129_v52 }
 0x489   : > { %v1275_v53 = vpop.f32.mrf.mxu3 }
 0x491   : > { %v1277_v13 = vpop.f32.mrf.mxu3 }
 0x499   : > { %v1303_v54 = vpop.f32.mrf.mxu3 }
 0x4a1   : > { %v1305_v36 = vpop.f32.mrf.mxu3 }
 0x4a3   : > { %v1261_v56 = vpop.f32.mrf.mxu1  ;;  %v1289_v59 = vpop.f32.mrf.mxu0 }
 0x4a4   : > { %v1262_v62 = vadd.f32 %v1261_v56, %v1152_v55  ;;  %v1290_v30 = vadd.f32 %v1289_v59, %v1152_v55 }
 0x4a6   : > { %v1276_v28 = vadd.f32 %v1275_v53, %v1262_v62  ;;  %v1304_v15 = vadd.f32 %v1303_v54, %v1290_v30 }
 0x4a8   : > { %v1308_v16 = vmax.f32 %v1276_v28, 0.0  ;;  %v1309_v60 = vmax.f32 %v1304_v15, 0.0 }
 0x4aa   : > { %v1392_v2 = vmul.f32 %v1308_v16, %v2274_v18  ;;  %v1393_v63 = vmul.f32 %v1309_v60, %v2277_v19  ;;  %1420 = vrot.lane.b32.xlu1 %v1308_v16, %s2220_s25  ;;  %1440 = vrot.lane.b32.xlu0 %v1308_v16, %s2219_s24 }
 0x4ab   : > { %1444 = vrot.lane.b32.xlu2 %v1309_v60, %s2219_s24  ;;  %v1263_v8 = vpop.f32.mrf.mxu1  ;;  %v1291_v9 = vpop.f32.mrf.mxu0 }
 0x4ac   : > { %v1396_v20 = vpack.c.bf16 %v1393_v63, %v1392_v2  ;;  %v1264_v21 = vadd.f32 %v1263_v8, %v1157_v45  ;;  %v1292_v10 = vadd.f32 %v1291_v9, %v1157_v45 }
 0x4ae   : > { %1398 = vst [vmem:[#allocation2 + $0x40] sm:$0xff] %v1396_v20  ;;  %v1278_v11 = vadd.f32 %v1277_v13, %v1264_v21  ;;  %v1306_v14 = vadd.f32 %v1305_v36, %v1292_v10 }
 0x4b0   : > { %v1310_v49 = vmax.f32 %v1278_v11, 0.0  ;;  %v1311_v23 = vmax.f32 %v1306_v14, 0.0 }
 0x4b2   : > { %v1394_v24 = vmul.f32 %v1310_v49, %v2274_v18  ;;  %v1395_v25 = vmul.f32 %v1311_v23, %v2277_v19  ;;  %1404 = vrot.lane.b32.xlu1 %v1309_v60, %s2221_s26  ;;  %1424 = vrot.lane.b32.xlu0 %v1309_v60, %s2220_s25  ;;  %v1481_v18 = vld [vmem:[%s3113_s1 + $0x88] sm:$0xff]  ;;  %v1483_v19 = vld [vmem:[%s3113_s1 + $0x98] sm:$0xff] }
 0x4b3   : > { %1400 = vrot.lane.b32.xlu2 %v1308_v16, %s2221_s26  ;;  %v2955_v46 = vpack.c.bf16 %v1483_v19, %v1481_v18 }
 0x4b4   : > { %v1397_v61 = vpack.c.bf16 %v1395_v25, %v1394_v24 }
 0x4b6   : > { %1399 = vst [vmem:[#allocation2 + $0x48] sm:$0xff] %v1397_v61 }
 0x4ba   : > { %1352 = vrot.lane.b32.xlu1 %v1308_v16, %s2223_s28  ;;  %1372 = vrot.lane.b32.xlu0 %v1308_v16, %s2222_s27 }
 0x4bb   : > { %1376 = vrot.lane.b32.xlu2 %v1309_v60, %s2222_s27 }
 0x4c2   : > { %1336 = vrot.lane.b32.xlu1 %v1309_v60, %s2224_s29  ;;  %1356 = vrot.lane.b32.xlu0 %v1309_v60, %s2223_s28 }
 0x4c3   : > { %1332 = vrot.lane.b32.xlu2 %v1308_v16, %s2224_s29 }
 0x4ca   : > { %1442 = vrot.lane.b32.xlu1 %v1310_v49, %s2219_s24  ;;  %1312 = vrot.lane.b32.xlu0 %v1308_v16, %s2225_s30 }
 0x4cb   : > { %1422 = vrot.lane.b32.xlu2 %v1310_v49, %s2220_s25 }
 0x4d2   : > { %1426 = vrot.lane.b32.xlu1 %v1311_v23, %s2220_s25  ;;  %1446 = vrot.lane.b32.xlu0 %v1311_v23, %s2219_s24 }
 0x4d3   : > { %1406 = vrot.lane.b32.xlu2 %v1311_v23, %s2221_s26 }
 0x4da   : > { %1374 = vrot.lane.b32.xlu1 %v1310_v49, %s2222_s27  ;;  %1402 = vrot.lane.b32.xlu0 %v1310_v49, %s2221_s26 }
 0x4db   : > { %1354 = vrot.lane.b32.xlu2 %v1310_v49, %s2223_s28 }
 0x4e2   : > { %1358 = vrot.lane.b32.xlu1 %v1311_v23, %s2223_s28  ;;  %1378 = vrot.lane.b32.xlu0 %v1311_v23, %s2222_s27 }
 0x4e3   : > { %1338 = vrot.lane.b32.xlu2 %v1311_v23, %s2224_s29 }
 0x4ea   : > { %1460 = vrot.lane.b32.xlu1 %v1308_v16, %s2226_s3  ;;  %1334 = vrot.lane.b32.xlu0 %v1310_v49, %s2224_s29 }
 0x4eb   : > { %1316 = vrot.lane.b32.xlu2 %v1309_v60, %s2225_s30 }
 0x4f2   : > { %1314 = vrot.lane.b32.xlu1 %v1310_v49, %s2225_s30  ;;  %1318 = vrot.lane.b32.xlu0 %v1311_v23, %s2225_s30 }
 0x4f3   : > { %1462 = vrot.lane.b32.xlu2 %v1310_v49, %s2226_s3 }
 0x4fa   : > { %1466 = vrot.lane.b32.xlu1 %v1311_v23, %s2226_s3  ;;  %1464 = vrot.lane.b32.xlu0 %v1309_v60, %s2226_s3 }
 0x4fb   : > { %1506 = vperm.xlu2 %2202, %v1481_v18  }
 0x502   : > { %1677 = vperm.xlu1 %2201, %v2968_v33   ;;  %1511 = vperm.xlu0 %2203, %v1483_v19  }
 0x505   : > { %v1445_v31 = vpop.permute.xlu2 %1444 }
 0x50d   : > { %v1401_v12 = vpop.permute.xlu2 %1400 }
 0x515   : > { %v1377_v17 = vpop.permute.xlu2 %1376 }
 0x51c   : > { %v1421_v7 = vpop.permute.xlu1 %1420  ;;  %v1441_v22 = vpop.permute.xlu0 %1440 }
 0x51d   : > { %v1448_v34 = vsel %vm372_vm3, %v1441_v22, %v1445_v31  ;;  %v1450_v50 = vsel %vm372_vm3, %v1445_v31, %v1441_v22  ;;  %v1333_v35 = vpop.permute.xlu2 %1332 }
 0x51e   : > { %v1452_v51 = vmul.f32 %v1448_v34, %v2370_v42  ;;  %v1453_v47 = vmul.f32 %v1450_v50, %v2373_v43 }
 0x520   : > { %v1456_v52 = vpack.c.bf16 %v1453_v47, %v1452_v51 }
 0x522   : > { %1458 = vst [vmem:[#allocation2 + $0x70] sm:$0xff] %v1456_v52 }
 0x524   : > { %v1405_v53 = vpop.permute.xlu1 %1404  ;;  %v1425_v13 = vpop.permute.xlu0 %1424 }
 0x525   : > { %v1408_v54 = vsel %vm326_vm4, %v1401_v12, %v1405_v53  ;;  %v1410_v55 = vsel %vm326_vm4, %v1405_v53, %v1401_v12  ;;  %v1428_v56 = vsel %vm349_vm2, %v1421_v7, %v1425_v13  ;;  %v1430_v59 = vsel %vm349_vm2, %v1425_v13, %v1421_v7  ;;  %v1423_v62 = vpop.permute.xlu2 %1422 }
 0x526   : > { %v1412_v30 = vmul.f32 %v1408_v54, %v2389_v57  ;;  %v1413_v28 = vmul.f32 %v1410_v55, %v2392_v58  ;;  %v1432_v15 = vmul.f32 %v1428_v56, %v2363_v40  ;;  %v1433_v16 = vmul.f32 %v1430_v59, %v2366_v41 }
 0x528   : > { %v1416_v60 = vpack.c.bf16 %v1413_v28, %v1412_v30  ;;  %v1436_v45 = vpack.c.bf16 %v1433_v16, %v1432_v15 }
 0x52a   : > { %1418 = vst [vmem:[#allocation2 + $0x50] sm:$0xff] %v1416_v60 }
 0x52b   : > { %1438 = vst [vmem:[#allocation2 + $0x60] sm:$0xff] %v1436_v45 }
 0x52c   : > { %v1353_v2 = vpop.permute.xlu1 %1352  ;;  %v1373_v63 = vpop.permute.xlu0 %1372 }
 0x52d   : > { %v1380_v36 = vsel %vm293_vm6, %v1373_v63, %v1377_v17  ;;  %v1382_v8 = vsel %vm293_vm6, %v1377_v17, %v1373_v63  ;;  %v1407_v9 = vpop.permute.xlu2 %1406 }
 0x52e   : > { %v1384_v20 = vmul.f32 %v1382_v8, %v2409_v5  ;;  %v1385_v21 = vmul.f32 %v1380_v36, %v2412_v6 }
 0x530   : > { %v1388_v10 = vpack.c.bf16 %v1385_v21, %v1384_v20  ;;  %v2089_v20 = vld [vmem:[#allocation2 + $0x70] sm:$0xf]  ;;  %v2178_v21 = vld [vmem:[#allocation2 + $0x74] sm:$0xf] }
 0x532   : > { %1390 = vst [vmem:[#allocation2 + $0x30] sm:$0xff] %v1388_v10 }
 0x534   : > { %v1337_v11 = vpop.permute.xlu1 %1336  ;;  %v1357_v14 = vpop.permute.xlu0 %1356 }
 0x535   : > { %v1340_v49 = vsel %vm247_vm7, %v1333_v35, %v1337_v11  ;;  %v1342_v23 = vsel %vm247_vm7, %v1337_v11, %v1333_v35  ;;  %v1360_v24 = vsel %vm270_vm5, %v1353_v2, %v1357_v14  ;;  %v1362_v25 = vsel %vm270_vm5, %v1357_v14, %v1353_v2  ;;  %v1355_v61 = vpop.permute.xlu2 %1354 }
 0x536   : > { %v1344_v18 = vmul.f32 %v1342_v23, %v2428_v26  ;;  %v1345_v19 = vmul.f32 %v1340_v49, %v2431_v27  ;;  %v1364_v31 = vmul.f32 %v1362_v25, %v2402_v3  ;;  %v1365_v12 = vmul.f32 %v1360_v24, %v2405_v4 }
 0x538   : > { %v1348_v17 = vpack.c.bf16 %v1345_v19, %v1344_v18  ;;  %v1368_v7 = vpack.c.bf16 %v1365_v12, %v1364_v31 }
 0x53a   : > { %1350 = vst [vmem:[#allocation2 + $0x10] sm:$0xff] %v1348_v17 }
 0x53b   : > { %1370 = vst [vmem:[#allocation2 + $0x20] sm:$0xff] %v1368_v7 }
 0x53c   : > { %v1443_v22 = vpop.permute.xlu1 %1442  ;;  %v1313_v34 = vpop.permute.xlu0 %1312 }
 0x53d   : > { %v3007_v50 = vpop.permute.xlu2 %1338 }
 0x544   : > { %v1427_v35 = vpop.permute.xlu1 %1426  ;;  %v1447_v51 = vpop.permute.xlu0 %1446 }
 0x545   : > { %v1429_v47 = vsel %vm349_vm2, %v1423_v62, %v1427_v35  ;;  %v1431_v52 = vsel %vm349_vm2, %v1427_v35, %v1423_v62  ;;  %v1449_v53 = vsel %vm372_vm3, %v1443_v22, %v1447_v51  ;;  %v1451_v13 = vsel %vm372_vm3, %v1447_v51, %v1443_v22  ;;  %v1317_v54 = vpop.permute.xlu2 %1316  ;;  %v2081_v22 = vld [vmem:[#allocation2 + $0x60] sm:$0xf] }
 0x546   : > { %v1434_v55 = vmul.f32 %v1429_v47, %v2363_v40  ;;  %v1435_v56 = vmul.f32 %v1431_v52, %v2366_v41  ;;  %v1454_v59 = vmul.f32 %v1449_v53, %v2370_v42  ;;  %v1455_v30 = vmul.f32 %v1451_v13, %v2373_v43  ;;  %v2073_v52 = vld [vmem:[#allocation2 + $0x50] sm:$0xf]  ;;  %v2174_v13 = vld [vmem:[#allocation2 + $0x54] sm:$0xf] }
 0x547   : > { %v1320_v28 = vsel %vm224_vm8, %v1313_v34, %v1317_v54  ;;  %v1322_v62 = vsel %vm224_vm8, %v1317_v54, %v1313_v34 }
 0x548   : > { %v1437_v15 = vpack.c.bf16 %v1435_v56, %v1434_v55  ;;  %v1457_v16 = vpack.c.bf16 %v1455_v30, %v1454_v59  ;;  %v1324_v60 = vmul.f32 %v1322_v62, %v2443_v38  ;;  %v1325_v45 = vmul.f32 %v1320_v28, %v2446_v44  ;;  %v2067_v30 = vld [vmem:[#allocation2 + $0x48] sm:$0xf0] }
 0x54a   : > { %1439 = vst [vmem:[#allocation2 + $0x68] sm:$0xff] %v1437_v15  ;;  %v1328_v40 = vpack.c.bf16 %v1325_v45, %v1324_v60  ;;  %v2065_v15 = vld [vmem:[#allocation2 + $0x40] sm:$0xf]  ;;  %v2172_v60 = vld [vmem:[#allocation2 + $0x44] sm:$0xf] }
 0x54b   : > { %1459 = vst [vmem:[#allocation2 + $0x78] sm:$0xff] %v1457_v16 }
 0x54c   : > { %1330 = vst [vmem:[#allocation2] sm:$0xff] %v1328_v40  ;;  %v1375_v41 = vpop.permute.xlu1 %1374  ;;  %v1403_v42 = vpop.permute.xlu0 %1402  ;;  %v2070_v40 = vor.u32 %v2172_v60, %v2067_v30 }
 0x54d   : > { %v1409_v43 = vsel %vm326_vm4, %v1403_v42, %v1407_v9  ;;  %v1411_v2 = vsel %vm326_vm4, %v1407_v9, %v1403_v42  ;;  %v2170_v42 = vld [vmem:[#allocation2 + $0x34] sm:$0xf] }
 0x54e   : > { %v1414_v63 = vmul.f32 %v1409_v43, %v2389_v57  ;;  %v1415_v36 = vmul.f32 %v1411_v2, %v2392_v58 }
 0x550   : > { %v1417_v8 = vpack.c.bf16 %v1415_v36, %v1414_v63 }
 0x551   : > { %v2177_v25 = vld [vmem:[#allocation2 + $0x64] sm:$0xf0]  ;;  %v2083_v19 = vld [vmem:[#allocation2 + $0x68] sm:$0xf0] }
 0x552   : > { %1419 = vst [vmem:[#allocation2 + $0x58] sm:$0xff] %v1417_v8  ;;  %v2179_v10 = vld [vmem:[#allocation2 + $0x74] sm:$0xf0]  ;;  %v2091_v11 = vld [vmem:[#allocation2 + $0x78] sm:$0xf0]  ;;  %v2082_v34 = vor.u32 %v2177_v25, %v2081_v22 }
 0x553   : > { %v2090_v14 = vor.u32 %v2179_v10, %v2089_v20  ;;  %v2094_v49 = vor.u32 %v2178_v21, %v2091_v11 }
 0x554   : > { %v1359_v23 = vpop.permute.xlu1 %1358  ;;  %v1379_v24 = vpop.permute.xlu0 %1378 }
 0x555   : > { %v1361_v18 = vsel %vm270_vm5, %v1355_v61, %v1359_v23  ;;  %v1363_v9 = vsel %vm270_vm5, %v1359_v23, %v1355_v61  ;;  %v1381_v57 = vsel %vm293_vm6, %v1375_v41, %v1379_v24  ;;  %v1383_v58 = vsel %vm293_vm6, %v1379_v24, %v1375_v41  ;;  %1607 = vmatpush.bf16.msra.mxu2 %v2090_v14  ;;  %v2176_v61 = vld [vmem:[#allocation2 + $0x64] sm:$0xf]  ;;  %v2057_v41 = vld [vmem:[#allocation2 + $0x30] sm:$0xf]  ;;  %v2049_v14 = vld [vmem:[#allocation2 + $0x20] sm:$0xf] }
 0x556   : > { %v1366_v31 = vmul.f32 %v1363_v9, %v2402_v3  ;;  %v1367_v12 = vmul.f32 %v1361_v18, %v2405_v4  ;;  %v1386_v17 = vmul.f32 %v1383_v58, %v2409_v5  ;;  %v1387_v7 = vmul.f32 %v1381_v57, %v2412_v6  ;;  %1635 = vmatpush.bf16.msra.mxu3 %v2094_v49  ;;  %v2173_v6 = vld [vmem:[#allocation2 + $0x44] sm:$0xf0]  ;;  %v2168_v23 = vld [vmem:[#allocation2 + $0x24] sm:$0xf]  ;;  %v2041_v18 = vld [vmem:[#allocation2 + $0x10] sm:$0xf] }
 0x557   : > { %v2086_v47 = vor.u32 %v2176_v61, %v2083_v19  ;;  %v2066_v16 = vor.u32 %v2173_v6, %v2065_v15  ;;  %v2166_v57 = vld [vmem:[#allocation2 + $0x14] sm:$0xf] }
 0x558   : > { %v1369_v35 = vpack.c.bf16 %v1367_v12, %v1366_v31  ;;  %v1389_v51 = vpack.c.bf16 %v1387_v7, %v1386_v17  ;;  %v1463_v12 = vpop.permute.xlu2 %1462 }
 0x559   : > { %1608 = vmatpush.bf16.msra.mxu2 %v2082_v34  ;;  %v2175_v53 = vld [vmem:[#allocation2 + $0x54] sm:$0xf0]  ;;  %v2075_v54 = vld [vmem:[#allocation2 + $0x58] sm:$0xf0] }
 0x55a   : > { %1371 = vst [vmem:[#allocation2 + $0x28] sm:$0xff] %v1369_v35  ;;  %1636 = vmatpush.bf16.msra.mxu3 %v2086_v47  ;;  %v2074_v3 = vor.u32 %v2175_v53, %v2073_v52  ;;  %v2078_v4 = vor.u32 %v2174_v13, %v2075_v54  ;;  %v2033_v13 = vld [vmem:[#allocation2] sm:$0xf]  ;;  %v1480_v54 = vld [vmem:[%s3113_s1 + $0x80] sm:$0xff] }
 0x55b   : > { %1391 = vst [vmem:[#allocation2 + $0x38] sm:$0xff] %v1389_v51 }
 0x55c   : > { %v1461_v5 = vpop.permute.xlu1 %1460  ;;  %v1335_v55 = vpop.permute.xlu0 %1334 }
 0x55d   : > { %v1341_v56 = vsel %vm247_vm7, %v1335_v55, %v3007_v50  ;;  %v1343_v59 = vsel %vm247_vm7, %v3007_v50, %v1335_v55  ;;  %1609 = vmatpush.bf16.msra.mxu2 %v2074_v3 }
 0x55e   : > { %v1346_v28 = vmul.f32 %v1343_v59, %v2428_v26  ;;  %v1347_v62 = vmul.f32 %v1341_v56, %v2431_v27  ;;  %1637 = vmatpush.bf16.msra.mxu3 %v2078_v4  ;;  %v2164_v4 = vld [vmem:[#allocation2 + $0x4] sm:$0xf] }
 0x560   : > { %v1349_v45 = vpack.c.bf16 %v1347_v62, %v1346_v28  ;;  %v1507_v60 = vpop.permute.xlu2 %1506 }
 0x561   : > { %1610 = vmatpush.bf16.msra.mxu2 %v2066_v16  ;;  %v2169_v26 = vld [vmem:[#allocation2 + $0x24] sm:$0xf0]  ;;  %v2051_v21 = vld [vmem:[#allocation2 + $0x28] sm:$0xf0] }
 0x562   : > { %1351 = vst [vmem:[#allocation2 + $0x18] sm:$0xff] %v1349_v45  ;;  %1638 = vmatpush.bf16.msra.mxu3 %v2070_v40  ;;  %v2171_v43 = vld [vmem:[#allocation2 + $0x34] sm:$0xf0]  ;;  %v2059_v2 = vld [vmem:[#allocation2 + $0x38] sm:$0xf0]  ;;  %v2050_v49 = vor.u32 %v2169_v26, %v2049_v14  ;;  %v2054_v25 = vor.u32 %v2168_v23, %v2051_v21 }
 0x563   : > { %v2058_v50 = vor.u32 %v2171_v43, %v2057_v41  ;;  %v2062_v63 = vor.u32 %v2170_v42, %v2059_v2 }
 0x564   : > { %v1315_v36 = vpop.permute.xlu1 %1314  ;;  %v1319_v8 = vpop.permute.xlu0 %1318 }
 0x565   : > { %v1321_v27 = vsel %vm224_vm8, %v1315_v36, %v1319_v8  ;;  %v1323_v20 = vsel %vm224_vm8, %v1319_v8, %v1315_v36  ;;  %1611 = vmatpush.bf16.msra.mxu2 %v2058_v50 }
 0x566   : > { %v1326_v10 = vmul.f32 %v1323_v20, %v2443_v38  ;;  %v1327_v11 = vmul.f32 %v1321_v27, %v2446_v44  ;;  %1639 = vmatpush.bf16.msra.mxu3 %v2062_v63 }
 0x568   : > { %v1329_v24 = vpack.c.bf16 %v1327_v11, %v1326_v10 }
 0x569   : > { %1612 = vmatpush.bf16.msra.mxu2 %v2050_v49  ;;  %v2167_v9 = vld [vmem:[#allocation2 + $0x14] sm:$0xf0]  ;;  %v2043_v58 = vld [vmem:[#allocation2 + $0x18] sm:$0xf0] }
 0x56a   : > { %1331 = vst [vmem:[#allocation2 + $0x8] sm:$0xff] %v1329_v24  ;;  %1640 = vmatpush.bf16.msra.mxu3 %v2054_v25  ;;  %v2042_v19 = vor.u32 %v2167_v9, %v2041_v18  ;;  %v2046_v31 = vor.u32 %v2166_v57, %v2043_v58  ;;  %v1672_v58 = vpack.c.bf16 %v2968_v33, %v2968_v33  ;;  %v1712_v33 = vld [vmem:[%s3113_s1 + $0xb8] sm:$0xff] }
 0x56c   : > { %v1467_v17 = vpop.permute.xlu1 %1466  ;;  %v1465_v38 = vpop.permute.xlu0 %1464 }
 0x56d   : > { %v1469_v44 = vsel %vm395_vm9, %v1463_v12, %v1467_v17  ;;  %v1471_v7 = vsel %vm395_vm9, %v1467_v17, %v1463_v12  ;;  %v1468_v22 = vsel %vm395_vm9, %v1461_v5, %v1465_v38  ;;  %v1470_v34 = vsel %vm395_vm9, %v1465_v38, %v1461_v5  ;;  %1613 = vmatpush.bf16.msra.mxu2 %v2042_v19 }
 0x56e   : > { %v1474_v61 = vmul.f32 %v2836_v37, %v1469_v44  ;;  %v1475_v35 = vmul.f32 %v2842_v48, %v1471_v7  ;;  %v1472_v51 = vmul.f32 %v2836_v37, %v1468_v22  ;;  %v1473_v47 = vmul.f32 %v2842_v48, %v1470_v34  ;;  %1641 = vmatpush.bf16.msra.mxu3 %v2046_v31 }
 0x56f   : > { %v1484_v48 = vpack.c.bf16 %v1482_v39, %v1480_v54 }
 0x570   : > { %v1477_v52 = vpack.c.bf16 %v1475_v35, %v1474_v61  ;;  %v1476_v53 = vpack.c.bf16 %v1473_v47, %v1472_v51 }
 0x571   : > { %v2165_v3 = vld [vmem:[#allocation2 + $0x4] sm:$0xf0]  ;;  %v2035_v5 = vld [vmem:[#allocation2 + $0x8] sm:$0xf0] }
 0x572   : > { %1479 = vst [vmem:[#allocation2 + $0x88] sm:$0xff] %v1477_v52  ;;  %v2034_v55 = vor.u32 %v2165_v3, %v2033_v13  ;;  %v2038_v37 = vor.u32 %v2164_v4, %v2035_v5  ;;  %v1727_v3 = vld [vmem:[%s3113_s1 + $0xf0] sm:$0xf]  ;;  %v1728_v5 = vld [vmem:[%s3113_s1 + $0xf8] sm:$0xf] }
 0x573   : > { %1478 = vst [vmem:[#allocation2 + $0x80] sm:$0xff] %v1476_v53 }
 0x574   : > { %1614 = vmatpush.bf16.msra.mxu2 %v2034_v55  ;;  %1642 = vmatpush.bf16.msra.mxu3 %v2038_v37  ;;  %v1512_v43 = vpop.permute.xlu0 %1511 }
 0x577   : > { %1615 = vmatmul.bf16.vlgmr.msra.gmra.mxu2 %v1484_v48  ;;  %1643 = vmatmul.bf16.vlgmr.msra.gmra.mxu3 %v1484_v48 }
 0x579   : > { %v2181_v6 = vld [vmem:[#allocation2 + $0x84] sm:$0xf0]  ;;  %v2099_v56 = vld [vmem:[#allocation2 + $0x88] sm:$0xf0] }
 0x57a   : > { %v2097_v59 = vld [vmem:[#allocation2 + $0x80] sm:$0xf]  ;;  %v2180_v30 = vld [vmem:[#allocation2 + $0x84] sm:$0xf] }
 0x57b   : > { %v2098_v28 = vor.u32 %v2181_v6, %v2097_v59  ;;  %v2102_v62 = vor.u32 %v2180_v30, %v2099_v56  ;;  %v2107_v30 = vld [vmem:[%s3113_s1 + $0xc0] ss:$8 sm:$0x3] }
 0x57d   : > { %1628 = vmatpush.bf16.msra.mxu1 %v2098_v28  ;;  %1656 = vmatpush.bf16.msra.mxu0 %v2102_v62  ;;  %v1740_v28 = vperm.slane %v2107_v30, 0 }
 0x580   : > { %2103 = vmatmul.msk.bf16.vlgmr.msra.gmra.mxu1 %vm534_vm10, %v2955_v46  ;;  %2104 = vmatmul.msk.bf16.vlgmr.msra.gmra.mxu0 %vm534_vm10, %v2955_v46 }
 0x5fa   : > { %v1616_v15 = vpop.f32.mrf.mxu2  ;;  %v1644_v16 = vpop.f32.mrf.mxu3 }
 0x5fb   : > { %v1617_v41 = vadd.f32 %v1616_v15, %v1507_v60  ;;  %v1645_v42 = vadd.f32 %v1644_v16, %v1507_v60 }
 0x5fd   : > { %v1630_v45 = vpop.f32.mrf.mxu1  ;;  %v1658_v40 = vpop.f32.mrf.mxu0 }
 0x5fe   : > { %v1631_v2 = vadd.f32 %v1630_v45, %v1617_v41  ;;  %v1659_v50 = vadd.f32 %v1658_v40, %v1645_v42 }
 0x600   : > { %v1663_v21 = vadd.f32 %v1631_v2, %v2707_v0  ;;  %v1664_v46 = vadd.f32 %v1659_v50, %v2709_v1  ;;  %v1678_v0 = vpop.permute.xlu1 %1677 }
 0x602   : > { %v1618_v63 = vpop.f32.mrf.mxu2  ;;  %v1646_v36 = vpop.f32.mrf.mxu3  ;;  %v1667_v23 = vmax.f32 %v1663_v21, 0.0  ;;  %v1668_v24 = vmax.f32 %v1664_v46, 0.0 }
 0x603   : > { %v1619_v8 = vadd.f32 %v1618_v63, %v1512_v43  ;;  %v1647_v26 = vadd.f32 %v1646_v36, %v1512_v43 }
 0x605   : > { %v1632_v27 = vpop.f32.mrf.mxu1  ;;  %v1660_v20 = vpop.f32.mrf.mxu0 }
 0x606   : > { %v1633_v10 = vadd.f32 %v1632_v27, %v1619_v8  ;;  %v1661_v11 = vadd.f32 %v1660_v20, %v1647_v26 }
 0x608   : > { %v1665_v14 = vadd.f32 %v1633_v10, %v2723_v29  ;;  %v1666_v49 = vadd.f32 %v1661_v11, %v2725_v32  ;;  %v1711_v32 = vld [vmem:[%s3113_s1 + $0xb0] sm:$0xff] }
 0x60a   : > { %v1669_v25 = vmax.f32 %v1665_v14, 0.0  ;;  %v1670_v18 = vmax.f32 %v1666_v49, 0.0 }
 0x60c   : > { %v1673_v9 = vpack.c.bf16 %v1669_v25, %v1667_v23  ;;  %v1674_v57 = vpack.c.bf16 %v1670_v18, %v1668_v24 }
 0x60e   : > { %1690 = vmatpush.bf16.msrb.mxu1 %v1673_v9  ;;  %1703 = vmatpush.bf16.msrb.mxu2 %v1674_v57 }
 0x611   : > { %2105 = vmatmul.msk.bf16.vlgmr.msrb.gmra.mxu1 %vm534_vm10, %v1672_v58  ;;  %2106 = vmatmul.msk.bf16.vlgmr.msrb.gmra.mxu2 %vm534_vm10, %v1672_v58 }
 0x68e   : > { %v1692_v1 = vpop.f32.mrf.mxu1 }
 0x68f   : > { %v1693_v29 = vadd.f32 %v1692_v1, %v1678_v0 }
 0x691   : > { %v1709_v19 = vmax.f32 %v1693_v29, 0.0 }
 0x693   : > { %v1713_v31 = vmul.f32 %v1711_v32, %v1709_v19 }
 0x694   : > { %v1705_v12 = vpop.f32.mrf.mxu2 }
 0x695   : > { %v1715_v17 = vrot.slane %v1713_v31, 4  ;;  %v1706_v38 = vadd.f32 %v1705_v12, %v1678_v0 }
 0x696   : > { %v1694_v44 = vpop.f32.mrf.mxu1 }
 0x697   : > { %v1716_v7 = vadd.f32 %v1715_v17, %v1713_v31  ;;  %v1710_v22 = vmax.f32 %v1706_v38, 0.0 }
 0x699   : > { %v1717_v34 = vrot.slane %v1716_v7, 2  ;;  %v1714_v61 = vmul.f32 %v1712_v33, %v1710_v22 }
 0x69b   : > { %v1718_v35 = vadd.f32 %v1717_v34, %v1716_v7  ;;  %v1721_v51 = vrot.slane %v1714_v61, 4 }
 0x69c   : > { %v1707_v47 = vpop.f32.mrf.mxu2 }
 0x69d   : > { %v1722_v52 = vadd.f32 %v1721_v51, %v1714_v61  ;;  %v1719_v53 = vrot.slane %v1718_v35, 1 }
 0x69f   : > { %v1723_v13 = vrot.slane %v1722_v52, 2  ;;  %v1720_v39 = vadd.f32 %v1719_v53, %v1718_v35 }
 0x6a1   : > { %v1724_v54 = vadd.f32 %v1723_v13, %v1722_v52  ;;  %v1731_v37 = vmul.f32 %v1727_v3, %v1720_v39 }
 0x6a3   : > { %v1725_v4 = vrot.slane %v1724_v54, 1  ;;  %v1734_v6 = vsel %vm1733_vm11, %v1731_v37, 0.0 }
 0x6a5   : > { %v1726_v55 = vadd.f32 %v1725_v4, %v1724_v54 }
 0x6a7   : > { %v1732_v48 = vmul.f32 %v1728_v5, %v1726_v55 }
 0x6a9   : > { %v1735_v56 = vsel %vm1733_vm11, %v1732_v48, 0.0 }
 0x6aa   : > { %v1736_v59 = vadd.f32 %v1735_v56, %v1734_v6 }
 0x6ac   : > { %1737 = vadd.xlane.f32.xlu2 %v1736_v59 }
 0x71f   : > { %v1738_v62 = vpop.xlane.xlu2 %1737 }
 0x720   : > { %v1742_v15 = vadd.f32 %v1740_v28, %v1738_v62 }
 0x722   : > { %2206 = vtanh.f32 %v1742_v15 }
 0x728   : > { %v2207_v16 = vpop.eup %2206 }
 0x729   : > { %1745 = vst.msk [vmem:[%s143_s17] sm:$0xf] %vm1744_vm12, %v2207_v16 }
 0x72a PF: > { %s12_s9 = sadd.s32 1, %s2216_s9  }
 0x72b   : > { %p9_p5 = scmp.ge.s32.totalorder %s12_s9, 4  }
 0x72d   :  { %11 = sbr.rel (!%p9_p5) target bundleno = 1 (0x1), region = 59 }

</bundles_post_ra>
